<compile_context>
chip_gen: v7x
topology: tpu7x:2x2x1
jax: 0.10.0
libtpu: 0.0.40
codegen_flags: <defaults>
</compile_context>

<pallas_src>
import functools

import jax
import jax.numpy as jnp
import numpy as np
from jax import lax
from jax.experimental import pallas as pl
from jax.experimental.pallas import tpu as pltpu

_LANE = 128


def _round_up(v, m):
    return (v + m - 1) // m * m


def gru_mean_covs_kernel(
    x_ref, mean_ref, covs_ref, wbeta_ref, bbeta_ref,
    wih_ref, whh_ref, bih_ref, bhn_ref,
    w1_ref, b1_ref, w1b_ref, b1b_ref, w2t_ref, b2_ref,
    out_ref, h_scratch, gi_scratch, *, unroll,
):
    c = pl.program_id(0)
    TC, Bp, D = x_ref.shape          # time chunk, padded batch, feature dim
    Hp = h_scratch.shape[-1]         # 128-padded hidden size

    @pl.when(c == 0)
    def _():
        # h_0 = beta_layer(covs)
        h_scratch[...] = (
            jnp.dot(covs_ref[...], wbeta_ref[...],
                    preferred_element_type=jnp.float32)
            + bbeta_ref[...]
        )

    # ---- pre-pass (off the serial critical path) -------------------------------
    # NaN -> per-feature-mean imputation fused with the input projection for the
    # whole time chunk in a single (TC*Bp, D) @ (D, 3Hp) matmul.  The r/z parts of
    # b_hh are already folded into bih_ref [A2].
    x = x_ref[...]                                              # (TC, Bp, D), f32
    x = jnp.where(jnp.isnan(x), mean_ref[...], x)
    gi = (
        jnp.dot(x.reshape(TC * Bp, D).astype(wih_ref.dtype), wih_ref[...],
                preferred_element_type=jnp.float32)
        + bih_ref[...]
    )                                                           # (TC*Bp, 3Hp) f32
    gi_scratch[...] = gi.reshape(TC, Bp, 3 * Hp).astype(gi_scratch.dtype)

    bhn = bhn_ref[...]                                          # (1, Hp), tiny -> hoist

    # ---- serial recurrence: only h @ W_hh per step -----------------------------
    def step(t, h):
        g = gi_scratch[t].astype(jnp.float32)                   # (Bp, 3Hp)
        w = whh_ref[...]                                        # streamed from VMEM [A6]
        gh = jnp.dot(h.astype(w.dtype), w, preferred_element_type=jnp.float32)
        # PyTorch gate order: r, z, n.  128-aligned slices [A1].
        r = jax.nn.sigmoid(g[:, 0 * Hp:1 * Hp] + gh[:, 0 * Hp:1 * Hp])
        z = jax.nn.sigmoid(g[:, 1 * Hp:2 * Hp] + gh[:, 1 * Hp:2 * Hp])
        n = jnp.tanh(g[:, 2 * Hp:3 * Hp] + r * (gh[:, 2 * Hp:3 * Hp] + bhn))
        return (1.0 - z) * n + z * h

    h_new = lax.fori_loop(0, TC, step, h_scratch[...], unroll=unroll)   # [A3]
    h_scratch[...] = h_new

    @pl.when(c == pl.num_programs(0) - 1)
    def _():
        # Classifier head on h_n: relu(L1) -> relu(L1bis) -> sigmoid(L2).
        p = jnp.dot(h_new.astype(w1_ref.dtype), w1_ref[...],
                    preferred_element_type=jnp.float32) + b1_ref[...]
        p = jnp.maximum(p, 0.0)
        p = jnp.dot(p.astype(w1b_ref.dtype), w1b_ref[...],
                    preferred_element_type=jnp.float32) + b1b_ref[...]
        p = jnp.maximum(p, 0.0)
        # Final (H1 -> 1) layer as a lane reduction (avoids an N=1 MXU matmul).
        logit = jnp.sum(p * w2t_ref[...], axis=-1, keepdims=True) + b2_ref[...]
        out_ref[...] = jax.nn.sigmoid(logit)


def _pad_last(a, new):
    pad = new - a.shape[-1]
    if pad == 0:
        return a
    return jnp.pad(a, [(0, 0)] * (a.ndim - 1) + [(0, pad)])


def _pad_gate_cols(w, H, Hp):
    """(..., 3H) -> (..., 3Hp), keeping PyTorch gate order [r|z|n], each padded to Hp."""
    return jnp.concatenate(
        [_pad_last(w[..., k * H:(k + 1) * H], Hp) for k in range(3)], axis=-1)


@functools.partial(jax.jit, static_argnames=("time_chunk", "use_bf16", "unroll"))
def gru_mean_with_covs_forward(x, covs, params, *, time_chunk=None,
                               use_bf16=False, unroll=None):
    """x: (B, T, D) possibly containing NaN; covs: (B, C). Returns (B,)."""
    B, T, D = x.shape
    H = params["w_hh"].shape[0]
    C = covs.shape[1]
    H1 = params["w1"].shape[1]
    Hp = _round_up(H, _LANE)                                     # [A1]
    H1p = _round_up(H1, _LANE)
    mm_dtype = jnp.bfloat16 if use_bf16 else jnp.float32         # [A5]

    # Pad the batch to a multiple of 8 sublanes (padded rows are zero, never NaN).
    Bp = _round_up(B, 8)
    if Bp != B:
        x = jnp.concatenate([x, jnp.zeros((Bp - B, T, D), x.dtype)], axis=0)
        covs = jnp.concatenate([covs, jnp.zeros((Bp - B, C), covs.dtype)], axis=0)

    # --- pad / repack weights so every gate slice & head matmul is 128-lane aligned ---
    w_beta = _pad_last(params["w_beta"], Hp)
    b_beta = _pad_last(params["b_beta"], Hp)
    # Fold r/z biases of b_hh into the pre-pass bias [A2]; keep b_hn separate.
    b_ih_fused = params["b_ih"] + jnp.concatenate(
        [params["b_hh"][:, :2 * H], jnp.zeros((1, H), params["b_hh"].dtype)], axis=-1)
    w_ih = _pad_gate_cols(params["w_ih"], H, Hp).astype(mm_dtype)
    w_hh = jnp.pad(_pad_gate_cols(params["w_hh"], H, Hp),
                   ((0, Hp - H), (0, 0))).astype(mm_dtype)
    b_ih = _pad_gate_cols(b_ih_fused, H, Hp)
    b_hn = _pad_last(params["b_hh"][:, 2 * H:], Hp)
    w1 = jnp.pad(_pad_last(params["w1"], H1p), ((0, Hp - H), (0, 0))).astype(mm_dtype)
    b1 = _pad_last(params["b1"], H1p)
    w1b = jnp.pad(_pad_last(params["w1b"], H1p),
                  ((0, H1p - H1), (0, 0))).astype(mm_dtype)
    b1b = _pad_last(params["b1b"], H1p)
    w2t = _pad_last(params["w2"].reshape(1, H1), H1p)            # row vector for lane-reduce
    b2 = params["b2"]
    mean = params["mean_feats"].reshape(1, D)

    # --- time chunk sizing against a VMEM budget (v7x has only 64 MiB) [A4] ---
    gi_item = 2 if use_bf16 else 4
    # per-timestep VMEM: gi_scratch row + f32 pre-pass temp row + double-buffered x row
    per_t = Bp * 3 * Hp * (gi_item + 4) + 2 * Bp * D * 4
    GI_BUDGET = 24 << 20
    if time_chunk is None:
        TC = T
        if T * per_t > GI_BUDGET:
            cap = max(1, GI_BUDGET // per_t)
            TC = max(d for d in range(1, min(T, cap) + 1) if T % d == 0)
    else:
        TC = time_chunk
    assert T % TC == 0, "time_chunk must divide T"
    num_chunks = T // TC
    unroll_ = unroll if unroll is not None else min(8, TC)       # [A3]

    const_arrays = (mean, covs, w_beta, b_beta, w_ih, w_hh, b_ih, b_hn,
                    w1, b1, w1b, b1b, w2t, b2)
    const_bytes = sum(int(np.prod(a.shape)) * a.dtype.itemsize for a in const_arrays)
    need = (2 * const_bytes                       # double-buffered constant operands
            + TC * Bp * 3 * Hp * gi_item          # gi_scratch
            + TC * Bp * 3 * Hp * 4                # f32 pre-pass matmul temp
            + 2 * TC * Bp * D * 4                 # double-buffered x chunk
            + Bp * Hp * 4 + 4 * Bp * 4            # h_scratch + out
            + (2 << 20))                          # margin
    vmem_limit = int(min(max(need, 32 << 20), 96 << 20))         # [A4]

    # TODO(synk): this (B,T,D)->(T,B,D) transpose is an HBM round trip of x; Mosaic does
    # not reliably lower the equivalent non-minor-dim 3-D transpose in-kernel, so it is
    # kept on the XLA side (see header note for the long-T alternative).
    x_tm = jnp.transpose(x, (1, 0, 2))                           # (T, Bp, D), time-major

    def const_spec(shape):
        zeros = tuple(0 for _ in shape)
        return pl.BlockSpec(shape, lambda c, _z=zeros: _z)

    grid_spec = pltpu.PrefetchScalarGridSpec(
        num_scalar_prefetch=0,
        grid=(num_chunks,),
        in_specs=[
            pl.BlockSpec((TC, Bp, D), lambda c: (c, 0, 0)),      # x time-chunk
            const_spec((1, D)),                                  # mean_feats
            const_spec((Bp, C)),                                 # covs
            const_spec((C, Hp)),                                 # w_beta
            const_spec((1, Hp)),                                 # b_beta
            const_spec((D, 3 * Hp)),                             # w_ih
            const_spec((Hp, 3 * Hp)),                            # w_hh
            const_spec((1, 3 * Hp)),                             # b_ih (+ b_hh r/z)
            const_spec((1, Hp)),                                 # b_hn
            const_spec((Hp, H1p)),                               # w1
            const_spec((1, H1p)),                                # b1
            const_spec((H1p, H1p)),                              # w1b
            const_spec((1, H1p)),                                # b1b
            const_spec((1, H1p)),                                # w2^T (row vector)
            const_spec((1, 1)),                                  # b2
        ],
        out_specs=pl.BlockSpec((Bp, 1), lambda c: (0, 0)),
        scratch_shapes=[
            pltpu.VMEM((Bp, Hp), jnp.float32),                   # hidden state
            pltpu.VMEM((TC, Bp, 3 * Hp), mm_dtype),              # precomputed gi
        ],
    )

    out = pl.pallas_call(
        functools.partial(gru_mean_covs_kernel, unroll=unroll_),
        out_shape=jax.ShapeDtypeStruct((Bp, 1), jnp.float32),
        grid_spec=grid_spec,
        compiler_params=pltpu.CompilerParams(
            # Strictly sequential over time chunks.  (A leading "parallel" batch-tile
            # axis for v7x's 2 TensorCores only pays off at Bp >= 256.)
            dimension_semantics=("arbitrary",),
            vmem_limit_bytes=vmem_limit),
    )(
        x_tm, mean, covs, w_beta, b_beta, w_ih, w_hh, b_ih, b_hn,
        w1, b1, w1b, b1b, w2t, b2,
    )
    return out[:B, 0]                           # pred[0, :, 0] in the PyTorch code


def reference_forward(x, covs, params):
    """Pure-JAX reference matching the PyTorch semantics."""
    H = params["w_hh"].shape[0]
    x_imp = jnp.where(jnp.isnan(x), params["mean_feats"][None, None, :], x)
    h = covs @ params["w_beta"] + params["b_beta"][0]

    def step(h, x_t):
        gi = x_t @ params["w_ih"] + params["b_ih"][0]
        gh = h @ params["w_hh"] + params["b_hh"][0]
        r = jax.nn.sigmoid(gi[:, :H] + gh[:, :H])
        z = jax.nn.sigmoid(gi[:, H:2 * H] + gh[:, H:2 * H])
        n = jnp.tanh(gi[:, 2 * H:] + r * gh[:, 2 * H:])
        return (1.0 - z) * n + z * h, None

    h_n, _ = jax.lax.scan(step, h, jnp.transpose(x_imp, (1, 0, 2)))
    p = jax.nn.relu(h_n @ params["w1"] + params["b1"][0])
    p = jax.nn.relu(p @ params["w1b"] + params["b1b"][0])
    p = jax.nn.sigmoid(p @ params["w2"] + params["b2"][0])
    return p[:, 0]


def init_params(key, input_dim, cov_dim, latents, hidden=100):
    """Deterministic init mirroring PyTorch default uniform(-1/sqrt(fan), +)."""
    ks = jax.random.split(key, 16)

    def unif(k, shape, fan):
        bound = 1.0 / np.sqrt(fan)
        return jax.random.uniform(k, shape, jnp.float32, -bound, bound)

    return {
        "mean_feats": jax.random.normal(ks[0], (input_dim,), jnp.float32),
        # beta_layer: Linear(cov_dim -> latents)
        "w_beta": unif(ks[1], (cov_dim, latents), cov_dim),
        "b_beta": unif(ks[2], (1, latents), cov_dim),
        # GRU(input_dim -> latents), gate order r, z, n, weights as (in, 3H)
        "w_ih": unif(ks[3], (input_dim, 3 * latents), latents),
        "w_hh": unif(ks[4], (latents, 3 * latents), latents),
        "b_ih": unif(ks[5], (1, 3 * latents), latents),
        "b_hh": unif(ks[6], (1, 3 * latents), latents),
        # classif_layer1: latents -> 100
        "w1": unif(ks[7], (latents, hidden), latents),
        "b1": unif(ks[8], (1, hidden), latents),
        # classif_layer1bis: 100 -> 100
        "w1b": unif(ks[9], (hidden, hidden), hidden),
        "b1b": unif(ks[10], (1, hidden), hidden),
        # classif_layer2: 100 -> 1
        "w2": unif(ks[11], (hidden, 1), hidden),
        "b2": unif(ks[12], (1, 1), hidden),
    }


# TODO(synk): imputation_mode='simple' (concat of [imputed x, observed mask, Delta])
# is not implemented; this kernel covers the 'mean' imputation path used here.

if __name__ == "__main__":
    B, T, D, C, H = 2, 8, 4, 5, 32

    key = jax.random.PRNGKey(0)
    k_p, k_x, k_nan, k_cov = jax.random.split(key, 4)

    params = init_params(k_p, input_dim=D, cov_dim=C, latents=H)

    x = jax.random.normal(k_x, (B, T, D), jnp.float32)
    nan_mask = jax.random.uniform(k_nan, (B, T, D)) < 0.3
    x = jnp.where(nan_mask, jnp.nan, x)          # missing values
    covs = jax.random.normal(k_cov, (B, C), jnp.float32)

    ref = jax.block_until_ready(reference_forward(x, covs, params))

    # f32 path: exact up to round-off.
    pred = jax.block_until_ready(gru_mean_with_covs_forward(x, covs, params))
    np.testing.assert_allclose(np.asarray(pred), np.asarray(ref),
                               rtol=1e-4, atol=1e-5)

    # bf16 MXU path (v6e/v7x lever) -- looser tolerance by design.
    pred_bf16 = jax.block_until_ready(
        gru_mean_with_covs_forward(x, covs, params, use_bf16=True))
    np.testing.assert_allclose(np.asarray(pred_bf16), np.asarray(ref),
                               rtol=5e-2, atol=5e-2)

    print("KERNEL_OK")
</pallas_src>

<mosaic_0001>
module attributes {stable_mosaic.version = 11 : i64} {
  func.func @gru_mean_covs_kernel(%arg0: i32, %arg1: memref<8x8x4xf32, #tpu.memory_space<vmem>>, %arg2: memref<1x4xf32, #tpu.memory_space<vmem>>, %arg3: memref<8x5xf32, #tpu.memory_space<vmem>>, %arg4: memref<5x128xf32, #tpu.memory_space<vmem>>, %arg5: memref<1x128xf32, #tpu.memory_space<vmem>>, %arg6: memref<4x384xf32, #tpu.memory_space<vmem>>, %arg7: memref<128x384xf32, #tpu.memory_space<vmem>>, %arg8: memref<1x384xf32, #tpu.memory_space<vmem>>, %arg9: memref<1x128xf32, #tpu.memory_space<vmem>>, %arg10: memref<128x128xf32, #tpu.memory_space<vmem>>, %arg11: memref<1x128xf32, #tpu.memory_space<vmem>>, %arg12: memref<128x128xf32, #tpu.memory_space<vmem>>, %arg13: memref<1x128xf32, #tpu.memory_space<vmem>>, %arg14: memref<1x128xf32, #tpu.memory_space<vmem>>, %arg15: memref<1x1xf32, #tpu.memory_space<vmem>>, %arg16: memref<8x1xf32, #tpu.memory_space<vmem>>, %arg17: memref<8x128xf32, #tpu.memory_space<vmem>>, %arg18: memref<8x8x384xf32, #tpu.memory_space<vmem>>) attributes {dimension_semantics = [#tpu.dimension_semantics<arbitrary>], iteration_bounds = array<i64: 1>, scalar_prefetch = 0 : i64, scratch_operands = 2 : i64, tpu.core_type = #tpu.core_type<tc>, window_params = [{transform_indices = @transform_0, window_bounds = array<i64: 8, 8, 4>}, {pipeline_mode = #tpu.pipeline_mode<synchronous>, transform_indices = @transform_1, window_bounds = array<i64: 1, 4>}, {pipeline_mode = #tpu.pipeline_mode<synchronous>, transform_indices = @transform_2, window_bounds = array<i64: 8, 5>}, {pipeline_mode = #tpu.pipeline_mode<synchronous>, transform_indices = @transform_3, window_bounds = array<i64: 5, 128>}, {pipeline_mode = #tpu.pipeline_mode<synchronous>, transform_indices = @transform_4, window_bounds = array<i64: 1, 128>}, {pipeline_mode = #tpu.pipeline_mode<synchronous>, transform_indices = @transform_5, window_bounds = array<i64: 4, 384>}, {pipeline_mode = #tpu.pipeline_mode<synchronous>, transform_indices = @transform_6, window_bounds = array<i64: 128, 384>}, {pipeline_mode = #tpu.pipeline_mode<synchronous>, transform_indices = @transform_7, window_bounds = array<i64: 1, 384>}, {pipeline_mode = #tpu.pipeline_mode<synchronous>, transform_indices = @transform_8, window_bounds = array<i64: 1, 128>}, {pipeline_mode = #tpu.pipeline_mode<synchronous>, transform_indices = @transform_9, window_bounds = array<i64: 128, 128>}, {pipeline_mode = #tpu.pipeline_mode<synchronous>, transform_indices = @transform_10, window_bounds = array<i64: 1, 128>}, {pipeline_mode = #tpu.pipeline_mode<synchronous>, transform_indices = @transform_11, window_bounds = array<i64: 128, 128>}, {pipeline_mode = #tpu.pipeline_mode<synchronous>, transform_indices = @transform_12, window_bounds = array<i64: 1, 128>}, {pipeline_mode = #tpu.pipeline_mode<synchronous>, transform_indices = @transform_13, window_bounds = array<i64: 1, 128>}, {pipeline_mode = #tpu.pipeline_mode<synchronous>, transform_indices = @transform_14, window_bounds = array<i64: 1, 1>}, {pipeline_mode = #tpu.pipeline_mode<synchronous>, transform_indices = @transform_15, window_bounds = array<i64: 8, 1>}]} {
    %c0_i32 = arith.constant 0 : i32
    %0 = arith.cmpi eq, %arg0, %c0_i32 : i32
    %1 = arith.extui %0 : i1 to i32
    %c0_i32_0 = arith.constant 0 : i32
    %2 = arith.cmpi ne, %1, %c0_i32_0 : i32
    scf.if %2 {
      %c0_85 = arith.constant 0 : index
      %c0_86 = arith.constant 0 : index
      %287 = vector.load %arg3[%c0_85, %c0_86] : memref<8x5xf32, #tpu.memory_space<vmem>>, vector<8x5xf32>
      %c0_87 = arith.constant 0 : index
      %c0_88 = arith.constant 0 : index
      %288 = vector.load %arg4[%c0_87, %c0_88] : memref<5x128xf32, #tpu.memory_space<vmem>>, vector<5x128xf32>
      %cst_89 = arith.constant dense<0.000000e+00> : vector<8x128xf32>
      %289 = tpu.matmul %287, %288, %cst_89 {dimension_numbers = #tpu.dot_dimension_numbers<[1], [0], [0], [1], [0, 0, 1, 1], [], []>} : vector<8x5xf32>, vector<5x128xf32>, vector<8x128xf32> -> vector<8x128xf32>
      %c0_90 = arith.constant 0 : index
      %c0_91 = arith.constant 0 : index
      %290 = vector.load %arg5[%c0_90, %c0_91] : memref<1x128xf32, #tpu.memory_space<vmem>>, vector<1x128xf32>
      %291 = vector.broadcast %290 : vector<1x128xf32> to vector<8x128xf32>
      %292 = arith.addf %289, %291 : vector<8x128xf32>
      %c0_92 = arith.constant 0 : index
      %c0_93 = arith.constant 0 : index
      %293 = vector.load %arg17[%c0_92, %c0_93] : memref<8x128xf32, #tpu.memory_space<vmem>>, vector<8x128xf32>
      tpu.vector_store %arg17[%c0_92, %c0_93], %292 {strides = array<i32>} : memref<8x128xf32, #tpu.memory_space<vmem>>, vector<8x128xf32>,
    } else {
    }
    %c0 = arith.constant 0 : index
    %c0_1 = arith.constant 0 : index
    %c0_2 = arith.constant 0 : index
    %3 = vector.load %arg1[%c0, %c0_1, %c0_2] : memref<8x8x4xf32, #tpu.memory_space<vmem>>, vector<8x8x4xf32>
    %4 = arith.cmpf one, %3, %3 : vector<8x8x4xf32>
    %c0_3 = arith.constant 0 : index
    %c0_4 = arith.constant 0 : index
    %5 = vector.load %arg2[%c0_3, %c0_4] : memref<1x4xf32, #tpu.memory_space<vmem>>, vector<1x4xf32>
    %6 = vector.shape_cast %5 : vector<1x4xf32> to vector<1x1x4xf32>
    %7 = vector.broadcast %6 : vector<1x1x4xf32> to vector<8x8x4xf32>
    %8 = arith.select %4, %7, %3 : vector<8x8x4xi1>, vector<8x8x4xf32>
    %9 = vector.shape_cast %8 : vector<8x8x4xf32> to vector<64x4xf32>
    %c0_5 = arith.constant 0 : index
    %c0_6 = arith.constant 0 : index
    %10 = vector.load %arg6[%c0_5, %c0_6] : memref<4x384xf32, #tpu.memory_space<vmem>>, vector<4x384xf32>
    %cst = arith.constant dense<0.000000e+00> : vector<64x384xf32>
    %11 = tpu.matmul %9, %10, %cst {dimension_numbers = #tpu.dot_dimension_numbers<[1], [0], [0], [1], [0, 0, 1, 1], [], []>} : vector<64x4xf32>, vector<4x384xf32>, vector<64x384xf32> -> vector<64x384xf32>
    %c0_7 = arith.constant 0 : index
    %c0_8 = arith.constant 0 : index
    %12 = vector.load %arg8[%c0_7, %c0_8] : memref<1x384xf32, #tpu.memory_space<vmem>>, vector<1x384xf32>
    %13 = vector.broadcast %12 : vector<1x384xf32> to vector<64x384xf32>
    %14 = arith.addf %11, %13 : vector<64x384xf32>
    %15 = vector.shape_cast %14 : vector<64x384xf32> to vector<8x8x384xf32>
    %c0_9 = arith.constant 0 : index
    %c0_10 = arith.constant 0 : index
    %c0_11 = arith.constant 0 : index
    %16 = vector.load %arg18[%c0_9, %c0_10, %c0_11] : memref<8x8x384xf32, #tpu.memory_space<vmem>>, vector<8x8x384xf32>
    tpu.vector_store %arg18[%c0_9, %c0_10, %c0_11], %15 {strides = array<i32>} : memref<8x8x384xf32, #tpu.memory_space<vmem>>, vector<8x8x384xf32>,
    %c0_12 = arith.constant 0 : index
    %c0_13 = arith.constant 0 : index
    %17 = vector.load %arg9[%c0_12, %c0_13] : memref<1x128xf32, #tpu.memory_space<vmem>>, vector<1x128xf32>
    %c0_14 = arith.constant 0 : index
    %c0_15 = arith.constant 0 : index
    %18 = vector.load %arg17[%c0_14, %c0_15] : memref<8x128xf32, #tpu.memory_space<vmem>>, vector<8x128xf32>
    %c0_i32_16 = arith.constant 0 : i32
    %19 = arith.index_cast %c0_i32_16 : i32 to index
    %c0_17 = arith.constant 0 : index
    %c0_18 = arith.constant 0 : index
    %20 = vector.load %arg18[%19, %c0_17, %c0_18] : memref<8x8x384xf32, #tpu.memory_space<vmem>>, vector<1x8x384xf32>
    %21 = vector.shape_cast %20 : vector<1x8x384xf32> to vector<8x384xf32>
    %c0_19 = arith.constant 0 : index
    %c0_20 = arith.constant 0 : index
    %22 = vector.load %arg7[%c0_19, %c0_20] : memref<128x384xf32, #tpu.memory_space<vmem>>, vector<128x384xf32>
    %cst_21 = arith.constant dense<0.000000e+00> : vector<8x384xf32>
    %23 = tpu.matmul %18, %22, %cst_21 {dimension_numbers = #tpu.dot_dimension_numbers<[1], [0], [0], [1], [0, 0, 1, 1], [], []>} : vector<8x128xf32>, vector<128x384xf32>, vector<8x384xf32> -> vector<8x384xf32>
    %24 = vector.extract_strided_slice %21 {offsets = [0, 0], sizes = [8, 128], strides = [1, 1]} : vector<8x384xf32> to vector<8x128xf32>
    %25 = vector.extract_strided_slice %23 {offsets = [0, 0], sizes = [8, 128], strides = [1, 1]} : vector<8x384xf32> to vector<8x128xf32>
    %26 = arith.addf %24, %25 : vector<8x128xf32>
    %27 = arith.negf %26 : vector<8x128xf32>
    %28 = math.exp %27 : vector<8x128xf32>
    %cst_22 = arith.constant 1.000000e+00 : f32
    %29 = vector.broadcast %cst_22 : f32 to vector<8x128xf32>
    %30 = arith.addf %29, %28 : vector<8x128xf32>
    %31 = arith.divf %29, %30 : vector<8x128xf32>
    %32 = vector.extract_strided_slice %21 {offsets = [0, 128], sizes = [8, 128], strides = [1, 1]} : vector<8x384xf32> to vector<8x128xf32>
    %33 = vector.extract_strided_slice %23 {offsets = [0, 128], sizes = [8, 128], strides = [1, 1]} : vector<8x384xf32> to vector<8x128xf32>
    %34 = arith.addf %32, %33 : vector<8x128xf32>
    %35 = arith.negf %34 : vector<8x128xf32>
    %36 = math.exp %35 : vector<8x128xf32>
    %cst_23 = arith.constant 1.000000e+00 : f32
    %37 = vector.broadcast %cst_23 : f32 to vector<8x128xf32>
    %38 = arith.addf %37, %36 : vector<8x128xf32>
    %39 = arith.divf %37, %38 : vector<8x128xf32>
    %40 = vector.extract_strided_slice %21 {offsets = [0, 256], sizes = [8, 128], strides = [1, 1]} : vector<8x384xf32> to vector<8x128xf32>
    %41 = vector.extract_strided_slice %23 {offsets = [0, 256], sizes = [8, 128], strides = [1, 1]} : vector<8x384xf32> to vector<8x128xf32>
    %42 = vector.broadcast %17 : vector<1x128xf32> to vector<8x128xf32>
    %43 = arith.addf %41, %42 : vector<8x128xf32>
    %44 = arith.mulf %31, %43 : vector<8x128xf32>
    %45 = arith.addf %40, %44 : vector<8x128xf32>
    %46 = math.tanh %45 : vector<8x128xf32>
    %cst_24 = arith.constant 1.000000e+00 : f32
    %47 = vector.broadcast %cst_24 : f32 to vector<8x128xf32>
    %48 = arith.subf %47, %39 : vector<8x128xf32>
    %49 = arith.mulf %48, %46 : vector<8x128xf32>
    %50 = arith.mulf %39, %18 : vector<8x128xf32>
    %51 = arith.addf %49, %50 : vector<8x128xf32>
    %c1_i32 = arith.constant 1 : i32
    %52 = arith.index_cast %c1_i32 : i32 to index
    %c0_25 = arith.constant 0 : index
    %c0_26 = arith.constant 0 : index
    %53 = vector.load %arg18[%52, %c0_25, %c0_26] : memref<8x8x384xf32, #tpu.memory_space<vmem>>, vector<1x8x384xf32>
    %54 = vector.shape_cast %53 : vector<1x8x384xf32> to vector<8x384xf32>
    %c0_27 = arith.constant 0 : index
    %c0_28 = arith.constant 0 : index
    %55 = vector.load %arg7[%c0_27, %c0_28] : memref<128x384xf32, #tpu.memory_space<vmem>>, vector<128x384xf32>
    %cst_29 = arith.constant dense<0.000000e+00> : vector<8x384xf32>
    %56 = tpu.matmul %51, %55, %cst_29 {dimension_numbers = #tpu.dot_dimension_numbers<[1], [0], [0], [1], [0, 0, 1, 1], [], []>} : vector<8x128xf32>, vector<128x384xf32>, vector<8x384xf32> -> vector<8x384xf32>
    %57 = vector.extract_strided_slice %54 {offsets = [0, 0], sizes = [8, 128], strides = [1, 1]} : vector<8x384xf32> to vector<8x128xf32>
    %58 = vector.extract_strided_slice %56 {offsets = [0, 0], sizes = [8, 128], strides = [1, 1]} : vector<8x384xf32> to vector<8x128xf32>
    %59 = arith.addf %57, %58 : vector<8x128xf32>
    %60 = arith.negf %59 : vector<8x128xf32>
    %61 = math.exp %60 : vector<8x128xf32>
    %cst_30 = arith.constant 1.000000e+00 : f32
    %62 = vector.broadcast %cst_30 : f32 to vector<8x128xf32>
    %63 = arith.addf %62, %61 : vector<8x128xf32>
    %64 = arith.divf %62, %63 : vector<8x128xf32>
    %65 = vector.extract_strided_slice %54 {offsets = [0, 128], sizes = [8, 128], strides = [1, 1]} : vector<8x384xf32> to vector<8x128xf32>
    %66 = vector.extract_strided_slice %56 {offsets = [0, 128], sizes = [8, 128], strides = [1, 1]} : vector<8x384xf32> to vector<8x128xf32>
    %67 = arith.addf %65, %66 : vector<8x128xf32>
    %68 = arith.negf %67 : vector<8x128xf32>
    %69 = math.exp %68 : vector<8x128xf32>
    %cst_31 = arith.constant 1.000000e+00 : f32
    %70 = vector.broadcast %cst_31 : f32 to vector<8x128xf32>
    %71 = arith.addf %70, %69 : vector<8x128xf32>
    %72 = arith.divf %70, %71 : vector<8x128xf32>
    %73 = vector.extract_strided_slice %54 {offsets = [0, 256], sizes = [8, 128], strides = [1, 1]} : vector<8x384xf32> to vector<8x128xf32>
    %74 = vector.extract_strided_slice %56 {offsets = [0, 256], sizes = [8, 128], strides = [1, 1]} : vector<8x384xf32> to vector<8x128xf32>
    %75 = vector.broadcast %17 : vector<1x128xf32> to vector<8x128xf32>
    %76 = arith.addf %74, %75 : vector<8x128xf32>
    %77 = arith.mulf %64, %76 : vector<8x128xf32>
    %78 = arith.addf %73, %77 : vector<8x128xf32>
    %79 = math.tanh %78 : vector<8x128xf32>
    %cst_32 = arith.constant 1.000000e+00 : f32
    %80 = vector.broadcast %cst_32 : f32 to vector<8x128xf32>
    %81 = arith.subf %80, %72 : vector<8x128xf32>
    %82 = arith.mulf %81, %79 : vector<8x128xf32>
    %83 = arith.mulf %72, %51 : vector<8x128xf32>
    %84 = arith.addf %82, %83 : vector<8x128xf32>
    %c2_i32 = arith.constant 2 : i32
    %85 = arith.index_cast %c2_i32 : i32 to index
    %c0_33 = arith.constant 0 : index
    %c0_34 = arith.constant 0 : index
    %86 = vector.load %arg18[%85, %c0_33, %c0_34] : memref<8x8x384xf32, #tpu.memory_space<vmem>>, vector<1x8x384xf32>
    %87 = vector.shape_cast %86 : vector<1x8x384xf32> to vector<8x384xf32>
    %c0_35 = arith.constant 0 : index
    %c0_36 = arith.constant 0 : index
    %88 = vector.load %arg7[%c0_35, %c0_36] : memref<128x384xf32, #tpu.memory_space<vmem>>, vector<128x384xf32>
    %cst_37 = arith.constant dense<0.000000e+00> : vector<8x384xf32>
    %89 = tpu.matmul %84, %88, %cst_37 {dimension_numbers = #tpu.dot_dimension_numbers<[1], [0], [0], [1], [0, 0, 1, 1], [], []>} : vector<8x128xf32>, vector<128x384xf32>, vector<8x384xf32> -> vector<8x384xf32>
    %90 = vector.extract_strided_slice %87 {offsets = [0, 0], sizes = [8, 128], strides = [1, 1]} : vector<8x384xf32> to vector<8x128xf32>
    %91 = vector.extract_strided_slice %89 {offsets = [0, 0], sizes = [8, 128], strides = [1, 1]} : vector<8x384xf32> to vector<8x128xf32>
    %92 = arith.addf %90, %91 : vector<8x128xf32>
    %93 = arith.negf %92 : vector<8x128xf32>
    %94 = math.exp %93 : vector<8x128xf32>
    %cst_38 = arith.constant 1.000000e+00 : f32
    %95 = vector.broadcast %cst_38 : f32 to vector<8x128xf32>
    %96 = arith.addf %95, %94 : vector<8x128xf32>
    %97 = arith.divf %95, %96 : vector<8x128xf32>
    %98 = vector.extract_strided_slice %87 {offsets = [0, 128], sizes = [8, 128], strides = [1, 1]} : vector<8x384xf32> to vector<8x128xf32>
    %99 = vector.extract_strided_slice %89 {offsets = [0, 128], sizes = [8, 128], strides = [1, 1]} : vector<8x384xf32> to vector<8x128xf32>
    %100 = arith.addf %98, %99 : vector<8x128xf32>
    %101 = arith.negf %100 : vector<8x128xf32>
    %102 = math.exp %101 : vector<8x128xf32>
    %cst_39 = arith.constant 1.000000e+00 : f32
    %103 = vector.broadcast %cst_39 : f32 to vector<8x128xf32>
    %104 = arith.addf %103, %102 : vector<8x128xf32>
    %105 = arith.divf %103, %104 : vector<8x128xf32>
    %106 = vector.extract_strided_slice %87 {offsets = [0, 256], sizes = [8, 128], strides = [1, 1]} : vector<8x384xf32> to vector<8x128xf32>
    %107 = vector.extract_strided_slice %89 {offsets = [0, 256], sizes = [8, 128], strides = [1, 1]} : vector<8x384xf32> to vector<8x128xf32>
    %108 = vector.broadcast %17 : vector<1x128xf32> to vector<8x128xf32>
    %109 = arith.addf %107, %108 : vector<8x128xf32>
    %110 = arith.mulf %97, %109 : vector<8x128xf32>
    %111 = arith.addf %106, %110 : vector<8x128xf32>
    %112 = math.tanh %111 : vector<8x128xf32>
    %cst_40 = arith.constant 1.000000e+00 : f32
    %113 = vector.broadcast %cst_40 : f32 to vector<8x128xf32>
    %114 = arith.subf %113, %105 : vector<8x128xf32>
    %115 = arith.mulf %114, %112 : vector<8x128xf32>
    %116 = arith.mulf %105, %84 : vector<8x128xf32>
    %117 = arith.addf %115, %116 : vector<8x128xf32>
    %c3_i32 = arith.constant 3 : i32
    %118 = arith.index_cast %c3_i32 : i32 to index
    %c0_41 = arith.constant 0 : index
    %c0_42 = arith.constant 0 : index
    %119 = vector.load %arg18[%118, %c0_41, %c0_42] : memref<8x8x384xf32, #tpu.memory_space<vmem>>, vector<1x8x384xf32>
    %120 = vector.shape_cast %119 : vector<1x8x384xf32> to vector<8x384xf32>
    %c0_43 = arith.constant 0 : index
    %c0_44 = arith.constant 0 : index
    %121 = vector.load %arg7[%c0_43, %c0_44] : memref<128x384xf32, #tpu.memory_space<vmem>>, vector<128x384xf32>
    %cst_45 = arith.constant dense<0.000000e+00> : vector<8x384xf32>
    %122 = tpu.matmul %117, %121, %cst_45 {dimension_numbers = #tpu.dot_dimension_numbers<[1], [0], [0], [1], [0, 0, 1, 1], [], []>} : vector<8x128xf32>, vector<128x384xf32>, vector<8x384xf32> -> vector<8x384xf32>
    %123 = vector.extract_strided_slice %120 {offsets = [0, 0], sizes = [8, 128], strides = [1, 1]} : vector<8x384xf32> to vector<8x128xf32>
    %124 = vector.extract_strided_slice %122 {offsets = [0, 0], sizes = [8, 128], strides = [1, 1]} : vector<8x384xf32> to vector<8x128xf32>
    %125 = arith.addf %123, %124 : vector<8x128xf32>
    %126 = arith.negf %125 : vector<8x128xf32>
    %127 = math.exp %126 : vector<8x128xf32>
    %cst_46 = arith.constant 1.000000e+00 : f32
    %128 = vector.broadcast %cst_46 : f32 to vector<8x128xf32>
    %129 = arith.addf %128, %127 : vector<8x128xf32>
    %130 = arith.divf %128, %129 : vector<8x128xf32>
    %131 = vector.extract_strided_slice %120 {offsets = [0, 128], sizes = [8, 128], strides = [1, 1]} : vector<8x384xf32> to vector<8x128xf32>
    %132 = vector.extract_strided_slice %122 {offsets = [0, 128], sizes = [8, 128], strides = [1, 1]} : vector<8x384xf32> to vector<8x128xf32>
    %133 = arith.addf %131, %132 : vector<8x128xf32>
    %134 = arith.negf %133 : vector<8x128xf32>
    %135 = math.exp %134 : vector<8x128xf32>
    %cst_47 = arith.constant 1.000000e+00 : f32
    %136 = vector.broadcast %cst_47 : f32 to vector<8x128xf32>
    %137 = arith.addf %136, %135 : vector<8x128xf32>
    %138 = arith.divf %136, %137 : vector<8x128xf32>
    %139 = vector.extract_strided_slice %120 {offsets = [0, 256], sizes = [8, 128], strides = [1, 1]} : vector<8x384xf32> to vector<8x128xf32>
    %140 = vector.extract_strided_slice %122 {offsets = [0, 256], sizes = [8, 128], strides = [1, 1]} : vector<8x384xf32> to vector<8x128xf32>
    %141 = vector.broadcast %17 : vector<1x128xf32> to vector<8x128xf32>
    %142 = arith.addf %140, %141 : vector<8x128xf32>
    %143 = arith.mulf %130, %142 : vector<8x128xf32>
    %144 = arith.addf %139, %143 : vector<8x128xf32>
    %145 = math.tanh %144 : vector<8x128xf32>
    %cst_48 = arith.constant 1.000000e+00 : f32
    %146 = vector.broadcast %cst_48 : f32 to vector<8x128xf32>
    %147 = arith.subf %146, %138 : vector<8x128xf32>
    %148 = arith.mulf %147, %145 : vector<8x128xf32>
    %149 = arith.mulf %138, %117 : vector<8x128xf32>
    %150 = arith.addf %148, %149 : vector<8x128xf32>
    %c4_i32 = arith.constant 4 : i32
    %151 = arith.index_cast %c4_i32 : i32 to index
    %c0_49 = arith.constant 0 : index
    %c0_50 = arith.constant 0 : index
    %152 = vector.load %arg18[%151, %c0_49, %c0_50] : memref<8x8x384xf32, #tpu.memory_space<vmem>>, vector<1x8x384xf32>
    %153 = vector.shape_cast %152 : vector<1x8x384xf32> to vector<8x384xf32>
    %c0_51 = arith.constant 0 : index
    %c0_52 = arith.constant 0 : index
    %154 = vector.load %arg7[%c0_51, %c0_52] : memref<128x384xf32, #tpu.memory_space<vmem>>, vector<128x384xf32>
    %cst_53 = arith.constant dense<0.000000e+00> : vector<8x384xf32>
    %155 = tpu.matmul %150, %154, %cst_53 {dimension_numbers = #tpu.dot_dimension_numbers<[1], [0], [0], [1], [0, 0, 1, 1], [], []>} : vector<8x128xf32>, vector<128x384xf32>, vector<8x384xf32> -> vector<8x384xf32>
    %156 = vector.extract_strided_slice %153 {offsets = [0, 0], sizes = [8, 128], strides = [1, 1]} : vector<8x384xf32> to vector<8x128xf32>
    %157 = vector.extract_strided_slice %155 {offsets = [0, 0], sizes = [8, 128], strides = [1, 1]} : vector<8x384xf32> to vector<8x128xf32>
    %158 = arith.addf %156, %157 : vector<8x128xf32>
    %159 = arith.negf %158 : vector<8x128xf32>
    %160 = math.exp %159 : vector<8x128xf32>
    %cst_54 = arith.constant 1.000000e+00 : f32
    %161 = vector.broadcast %cst_54 : f32 to vector<8x128xf32>
    %162 = arith.addf %161, %160 : vector<8x128xf32>
    %163 = arith.divf %161, %162 : vector<8x128xf32>
    %164 = vector.extract_strided_slice %153 {offsets = [0, 128], sizes = [8, 128], strides = [1, 1]} : vector<8x384xf32> to vector<8x128xf32>
    %165 = vector.extract_strided_slice %155 {offsets = [0, 128], sizes = [8, 128], strides = [1, 1]} : vector<8x384xf32> to vector<8x128xf32>
    %166 = arith.addf %164, %165 : vector<8x128xf32>
    %167 = arith.negf %166 : vector<8x128xf32>
    %168 = math.exp %167 : vector<8x128xf32>
    %cst_55 = arith.constant 1.000000e+00 : f32
    %169 = vector.broadcast %cst_55 : f32 to vector<8x128xf32>
    %170 = arith.addf %169, %168 : vector<8x128xf32>
    %171 = arith.divf %169, %170 : vector<8x128xf32>
    %172 = vector.extract_strided_slice %153 {offsets = [0, 256], sizes = [8, 128], strides = [1, 1]} : vector<8x384xf32> to vector<8x128xf32>
    %173 = vector.extract_strided_slice %155 {offsets = [0, 256], sizes = [8, 128], strides = [1, 1]} : vector<8x384xf32> to vector<8x128xf32>
    %174 = vector.broadcast %17 : vector<1x128xf32> to vector<8x128xf32>
    %175 = arith.addf %173, %174 : vector<8x128xf32>
    %176 = arith.mulf %163, %175 : vector<8x128xf32>
    %177 = arith.addf %172, %176 : vector<8x128xf32>
    %178 = math.tanh %177 : vector<8x128xf32>
    %cst_56 = arith.constant 1.000000e+00 : f32
    %179 = vector.broadcast %cst_56 : f32 to vector<8x128xf32>
    %180 = arith.subf %179, %171 : vector<8x128xf32>
    %181 = arith.mulf %180, %178 : vector<8x128xf32>
    %182 = arith.mulf %171, %150 : vector<8x128xf32>
    %183 = arith.addf %181, %182 : vector<8x128xf32>
    %c5_i32 = arith.constant 5 : i32
    %184 = arith.index_cast %c5_i32 : i32 to index
    %c0_57 = arith.constant 0 : index
    %c0_58 = arith.constant 0 : index
    %185 = vector.load %arg18[%184, %c0_57, %c0_58] : memref<8x8x384xf32, #tpu.memory_space<vmem>>, vector<1x8x384xf32>
    %186 = vector.shape_cast %185 : vector<1x8x384xf32> to vector<8x384xf32>
    %c0_59 = arith.constant 0 : index
    %c0_60 = arith.constant 0 : index
    %187 = vector.load %arg7[%c0_59, %c0_60] : memref<128x384xf32, #tpu.memory_space<vmem>>, vector<128x384xf32>
    %cst_61 = arith.constant dense<0.000000e+00> : vector<8x384xf32>
    %188 = tpu.matmul %183, %187, %cst_61 {dimension_numbers = #tpu.dot_dimension_numbers<[1], [0], [0], [1], [0, 0, 1, 1], [], []>} : vector<8x128xf32>, vector<128x384xf32>, vector<8x384xf32> -> vector<8x384xf32>
    %189 = vector.extract_strided_slice %186 {offsets = [0, 0], sizes = [8, 128], strides = [1, 1]} : vector<8x384xf32> to vector<8x128xf32>
    %190 = vector.extract_strided_slice %188 {offsets = [0, 0], sizes = [8, 128], strides = [1, 1]} : vector<8x384xf32> to vector<8x128xf32>
    %191 = arith.addf %189, %190 : vector<8x128xf32>
    %192 = arith.negf %191 : vector<8x128xf32>
    %193 = math.exp %192 : vector<8x128xf32>
    %cst_62 = arith.constant 1.000000e+00 : f32
    %194 = vector.broadcast %cst_62 : f32 to vector<8x128xf32>
    %195 = arith.addf %194, %193 : vector<8x128xf32>
    %196 = arith.divf %194, %195 : vector<8x128xf32>
    %197 = vector.extract_strided_slice %186 {offsets = [0, 128], sizes = [8, 128], strides = [1, 1]} : vector<8x384xf32> to vector<8x128xf32>
    %198 = vector.extract_strided_slice %188 {offsets = [0, 128], sizes = [8, 128], strides = [1, 1]} : vector<8x384xf32> to vector<8x128xf32>
    %199 = arith.addf %197, %198 : vector<8x128xf32>
    %200 = arith.negf %199 : vector<8x128xf32>
    %201 = math.exp %200 : vector<8x128xf32>
    %cst_63 = arith.constant 1.000000e+00 : f32
    %202 = vector.broadcast %cst_63 : f32 to vector<8x128xf32>
    %203 = arith.addf %202, %201 : vector<8x128xf32>
    %204 = arith.divf %202, %203 : vector<8x128xf32>
    %205 = vector.extract_strided_slice %186 {offsets = [0, 256], sizes = [8, 128], strides = [1, 1]} : vector<8x384xf32> to vector<8x128xf32>
    %206 = vector.extract_strided_slice %188 {offsets = [0, 256], sizes = [8, 128], strides = [1, 1]} : vector<8x384xf32> to vector<8x128xf32>
    %207 = vector.broadcast %17 : vector<1x128xf32> to vector<8x128xf32>
    %208 = arith.addf %206, %207 : vector<8x128xf32>
    %209 = arith.mulf %196, %208 : vector<8x128xf32>
    %210 = arith.addf %205, %209 : vector<8x128xf32>
    %211 = math.tanh %210 : vector<8x128xf32>
    %cst_64 = arith.constant 1.000000e+00 : f32
    %212 = vector.broadcast %cst_64 : f32 to vector<8x128xf32>
    %213 = arith.subf %212, %204 : vector<8x128xf32>
    %214 = arith.mulf %213, %211 : vector<8x128xf32>
    %215 = arith.mulf %204, %183 : vector<8x128xf32>
    %216 = arith.addf %214, %215 : vector<8x128xf32>
    %c6_i32 = arith.constant 6 : i32
    %217 = arith.index_cast %c6_i32 : i32 to index
    %c0_65 = arith.constant 0 : index
    %c0_66 = arith.constant 0 : index
    %218 = vector.load %arg18[%217, %c0_65, %c0_66] : memref<8x8x384xf32, #tpu.memory_space<vmem>>, vector<1x8x384xf32>
    %219 = vector.shape_cast %218 : vector<1x8x384xf32> to vector<8x384xf32>
    %c0_67 = arith.constant 0 : index
    %c0_68 = arith.constant 0 : index
    %220 = vector.load %arg7[%c0_67, %c0_68] : memref<128x384xf32, #tpu.memory_space<vmem>>, vector<128x384xf32>
    %cst_69 = arith.constant dense<0.000000e+00> : vector<8x384xf32>
    %221 = tpu.matmul %216, %220, %cst_69 {dimension_numbers = #tpu.dot_dimension_numbers<[1], [0], [0], [1], [0, 0, 1, 1], [], []>} : vector<8x128xf32>, vector<128x384xf32>, vector<8x384xf32> -> vector<8x384xf32>
    %222 = vector.extract_strided_slice %219 {offsets = [0, 0], sizes = [8, 128], strides = [1, 1]} : vector<8x384xf32> to vector<8x128xf32>
    %223 = vector.extract_strided_slice %221 {offsets = [0, 0], sizes = [8, 128], strides = [1, 1]} : vector<8x384xf32> to vector<8x128xf32>
    %224 = arith.addf %222, %223 : vector<8x128xf32>
    %225 = arith.negf %224 : vector<8x128xf32>
    %226 = math.exp %225 : vector<8x128xf32>
    %cst_70 = arith.constant 1.000000e+00 : f32
    %227 = vector.broadcast %cst_70 : f32 to vector<8x128xf32>
    %228 = arith.addf %227, %226 : vector<8x128xf32>
    %229 = arith.divf %227, %228 : vector<8x128xf32>
    %230 = vector.extract_strided_slice %219 {offsets = [0, 128], sizes = [8, 128], strides = [1, 1]} : vector<8x384xf32> to vector<8x128xf32>
    %231 = vector.extract_strided_slice %221 {offsets = [0, 128], sizes = [8, 128], strides = [1, 1]} : vector<8x384xf32> to vector<8x128xf32>
    %232 = arith.addf %230, %231 : vector<8x128xf32>
    %233 = arith.negf %232 : vector<8x128xf32>
    %234 = math.exp %233 : vector<8x128xf32>
    %cst_71 = arith.constant 1.000000e+00 : f32
    %235 = vector.broadcast %cst_71 : f32 to vector<8x128xf32>
    %236 = arith.addf %235, %234 : vector<8x128xf32>
    %237 = arith.divf %235, %236 : vector<8x128xf32>
    %238 = vector.extract_strided_slice %219 {offsets = [0, 256], sizes = [8, 128], strides = [1, 1]} : vector<8x384xf32> to vector<8x128xf32>
    %239 = vector.extract_strided_slice %221 {offsets = [0, 256], sizes = [8, 128], strides = [1, 1]} : vector<8x384xf32> to vector<8x128xf32>
    %240 = vector.broadcast %17 : vector<1x128xf32> to vector<8x128xf32>
    %241 = arith.addf %239, %240 : vector<8x128xf32>
    %242 = arith.mulf %229, %241 : vector<8x128xf32>
    %243 = arith.addf %238, %242 : vector<8x128xf32>
    %244 = math.tanh %243 : vector<8x128xf32>
    %cst_72 = arith.constant 1.000000e+00 : f32
    %245 = vector.broadcast %cst_72 : f32 to vector<8x128xf32>
    %246 = arith.subf %245, %237 : vector<8x128xf32>
    %247 = arith.mulf %246, %244 : vector<8x128xf32>
    %248 = arith.mulf %237, %216 : vector<8x128xf32>
    %249 = arith.addf %247, %248 : vector<8x128xf32>
    %c7_i32 = arith.constant 7 : i32
    %250 = arith.index_cast %c7_i32 : i32 to index
    %c0_73 = arith.constant 0 : index
    %c0_74 = arith.constant 0 : index
    %251 = vector.load %arg18[%250, %c0_73, %c0_74] : memref<8x8x384xf32, #tpu.memory_space<vmem>>, vector<1x8x384xf32>
    %252 = vector.shape_cast %251 : vector<1x8x384xf32> to vector<8x384xf32>
    %c0_75 = arith.constant 0 : index
    %c0_76 = arith.constant 0 : index
    %253 = vector.load %arg7[%c0_75, %c0_76] : memref<128x384xf32, #tpu.memory_space<vmem>>, vector<128x384xf32>
    %cst_77 = arith.constant dense<0.000000e+00> : vector<8x384xf32>
    %254 = tpu.matmul %249, %253, %cst_77 {dimension_numbers = #tpu.dot_dimension_numbers<[1], [0], [0], [1], [0, 0, 1, 1], [], []>} : vector<8x128xf32>, vector<128x384xf32>, vector<8x384xf32> -> vector<8x384xf32>
    %255 = vector.extract_strided_slice %252 {offsets = [0, 0], sizes = [8, 128], strides = [1, 1]} : vector<8x384xf32> to vector<8x128xf32>
    %256 = vector.extract_strided_slice %254 {offsets = [0, 0], sizes = [8, 128], strides = [1, 1]} : vector<8x384xf32> to vector<8x128xf32>
    %257 = arith.addf %255, %256 : vector<8x128xf32>
    %258 = arith.negf %257 : vector<8x128xf32>
    %259 = math.exp %258 : vector<8x128xf32>
    %cst_78 = arith.constant 1.000000e+00 : f32
    %260 = vector.broadcast %cst_78 : f32 to vector<8x128xf32>
    %261 = arith.addf %260, %259 : vector<8x128xf32>
    %262 = arith.divf %260, %261 : vector<8x128xf32>
    %263 = vector.extract_strided_slice %252 {offsets = [0, 128], sizes = [8, 128], strides = [1, 1]} : vector<8x384xf32> to vector<8x128xf32>
    %264 = vector.extract_strided_slice %254 {offsets = [0, 128], sizes = [8, 128], strides = [1, 1]} : vector<8x384xf32> to vector<8x128xf32>
    %265 = arith.addf %263, %264 : vector<8x128xf32>
    %266 = arith.negf %265 : vector<8x128xf32>
    %267 = math.exp %266 : vector<8x128xf32>
    %cst_79 = arith.constant 1.000000e+00 : f32
    %268 = vector.broadcast %cst_79 : f32 to vector<8x128xf32>
    %269 = arith.addf %268, %267 : vector<8x128xf32>
    %270 = arith.divf %268, %269 : vector<8x128xf32>
    %271 = vector.extract_strided_slice %252 {offsets = [0, 256], sizes = [8, 128], strides = [1, 1]} : vector<8x384xf32> to vector<8x128xf32>
    %272 = vector.extract_strided_slice %254 {offsets = [0, 256], sizes = [8, 128], strides = [1, 1]} : vector<8x384xf32> to vector<8x128xf32>
    %273 = vector.broadcast %17 : vector<1x128xf32> to vector<8x128xf32>
    %274 = arith.addf %272, %273 : vector<8x128xf32>
    %275 = arith.mulf %262, %274 : vector<8x128xf32>
    %276 = arith.addf %271, %275 : vector<8x128xf32>
    %277 = math.tanh %276 : vector<8x128xf32>
    %cst_80 = arith.constant 1.000000e+00 : f32
    %278 = vector.broadcast %cst_80 : f32 to vector<8x128xf32>
    %279 = arith.subf %278, %270 : vector<8x128xf32>
    %280 = arith.mulf %279, %277 : vector<8x128xf32>
    %281 = arith.mulf %270, %249 : vector<8x128xf32>
    %282 = arith.addf %280, %281 : vector<8x128xf32>
    %c8_i32 = arith.constant 8 : i32
    %c0_81 = arith.constant 0 : index
    %c0_82 = arith.constant 0 : index
    %283 = vector.load %arg17[%c0_81, %c0_82] : memref<8x128xf32, #tpu.memory_space<vmem>>, vector<8x128xf32>
    tpu.vector_store %arg17[%c0_81, %c0_82], %282 {strides = array<i32>} : memref<8x128xf32, #tpu.memory_space<vmem>>, vector<8x128xf32>,
    %c0_i32_83 = arith.constant 0 : i32
    %284 = arith.cmpi eq, %arg0, %c0_i32_83 : i32
    %285 = arith.extui %284 : i1 to i32
    %c0_i32_84 = arith.constant 0 : i32
    %286 = arith.cmpi ne, %285, %c0_i32_84 : i32
    scf.if %286 {
      %c0_85 = arith.constant 0 : index
      %c0_86 = arith.constant 0 : index
      %287 = vector.load %arg10[%c0_85, %c0_86] : memref<128x128xf32, #tpu.memory_space<vmem>>, vector<128x128xf32>
      %cst_87 = arith.constant dense<0.000000e+00> : vector<8x128xf32>
      %288 = tpu.matmul %282, %287, %cst_87 {dimension_numbers = #tpu.dot_dimension_numbers<[1], [0], [0], [1], [0, 0, 1, 1], [], []>} : vector<8x128xf32>, vector<128x128xf32>, vector<8x128xf32> -> vector<8x128xf32>
      %c0_88 = arith.constant 0 : index
      %c0_89 = arith.constant 0 : index
      %289 = vector.load %arg11[%c0_88, %c0_89] : memref<1x128xf32, #tpu.memory_space<vmem>>, vector<1x128xf32>
      %290 = vector.broadcast %289 : vector<1x128xf32> to vector<8x128xf32>
      %291 = arith.addf %288, %290 : vector<8x128xf32>
      %cst_90 = arith.constant 0.000000e+00 : f32
      %292 = vector.broadcast %cst_90 : f32 to vector<8x128xf32>
      %293 = arith.maximumf %291, %292 : vector<8x128xf32>
      %c0_91 = arith.constant 0 : index
      %c0_92 = arith.constant 0 : index
      %294 = vector.load %arg12[%c0_91, %c0_92] : memref<128x128xf32, #tpu.memory_space<vmem>>, vector<128x128xf32>
      %cst_93 = arith.constant dense<0.000000e+00> : vector<8x128xf32>
      %295 = tpu.matmul %293, %294, %cst_93 {dimension_numbers = #tpu.dot_dimension_numbers<[1], [0], [0], [1], [0, 0, 1, 1], [], []>} : vector<8x128xf32>, vector<128x128xf32>, vector<8x128xf32> -> vector<8x128xf32>
      %c0_94 = arith.constant 0 : index
      %c0_95 = arith.constant 0 : index
      %296 = vector.load %arg13[%c0_94, %c0_95] : memref<1x128xf32, #tpu.memory_space<vmem>>, vector<1x128xf32>
      %297 = vector.broadcast %296 : vector<1x128xf32> to vector<8x128xf32>
      %298 = arith.addf %295, %297 : vector<8x128xf32>
      %cst_96 = arith.constant 0.000000e+00 : f32
      %299 = vector.broadcast %cst_96 : f32 to vector<8x128xf32>
      %300 = arith.maximumf %298, %299 : vector<8x128xf32>
      %c0_97 = arith.constant 0 : index
      %c0_98 = arith.constant 0 : index
      %301 = vector.load %arg14[%c0_97, %c0_98] : memref<1x128xf32, #tpu.memory_space<vmem>>, vector<1x128xf32>
      %302 = vector.broadcast %301 : vector<1x128xf32> to vector<8x128xf32>
      %303 = arith.mulf %300, %302 : vector<8x128xf32>
      %cst_99 = arith.constant dense<0.000000e+00> : vector<8xf32>
      %304 = vector.multi_reduction <add>, %303, %cst_99 [1] : vector<8x128xf32> to vector<8xf32>
      %305 = vector.shape_cast %304 : vector<8xf32> to vector<8x1xf32>
      %c0_100 = arith.constant 0 : index
      %c0_101 = arith.constant 0 : index
      %306 = vector.load %arg15[%c0_100, %c0_101] : memref<1x1xf32, #tpu.memory_space<vmem>>, vector<1x1xf32>
      %307 = vector.broadcast %306 : vector<1x1xf32> to vector<8x1xf32>
      %308 = arith.addf %305, %307 : vector<8x1xf32>
      %309 = arith.negf %308 : vector<8x1xf32>
      %310 = math.exp %309 : vector<8x1xf32>
      %cst_102 = arith.constant 1.000000e+00 : f32
      %311 = vector.broadcast %cst_102 : f32 to vector<8x1xf32>
      %312 = arith.addf %311, %310 : vector<8x1xf32>
      %313 = arith.divf %311, %312 : vector<8x1xf32>
      %c0_103 = arith.constant 0 : index
      %c0_104 = arith.constant 0 : index
      %314 = vector.load %arg16[%c0_103, %c0_104] : memref<8x1xf32, #tpu.memory_space<vmem>>, vector<8x1xf32>
      tpu.vector_store %arg16[%c0_103, %c0_104], %313 {strides = array<i32>} : memref<8x1xf32, #tpu.memory_space<vmem>>, vector<8x1xf32>,
    } else {
    }
    return
  }
  func.func @transform_0(%arg0: i32) -> (i32, i32, i32) {
    %c0_i32 = arith.constant 0 : i32
    %c0_i32_0 = arith.constant 0 : i32
    %c0_i32_1 = arith.constant 0 : i32
    return %arg0, %c0_i32, %c0_i32_0 : i32, i32, i32
  }
  func.func @transform_1(%arg0: i32) -> (i32, i32) {
    %c0_i32 = arith.constant 0 : i32
    %c0_i32_0 = arith.constant 0 : i32
    %c0_i32_1 = arith.constant 0 : i32
    return %c0_i32, %c0_i32_0 : i32, i32
  }
  func.func @transform_2(%arg0: i32) -> (i32, i32) {
    %c0_i32 = arith.constant 0 : i32
    %c0_i32_0 = arith.constant 0 : i32
    %c0_i32_1 = arith.constant 0 : i32
    return %c0_i32, %c0_i32_0 : i32, i32
  }
  func.func @transform_3(%arg0: i32) -> (i32, i32) {
    %c0_i32 = arith.constant 0 : i32
    %c0_i32_0 = arith.constant 0 : i32
    %c0_i32_1 = arith.constant 0 : i32
    return %c0_i32, %c0_i32_0 : i32, i32
  }
  func.func @transform_4(%arg0: i32) -> (i32, i32) {
    %c0_i32 = arith.constant 0 : i32
    %c0_i32_0 = arith.constant 0 : i32
    %c0_i32_1 = arith.constant 0 : i32
    return %c0_i32, %c0_i32_0 : i32, i32
  }
  func.func @transform_5(%arg0: i32) -> (i32, i32) {
    %c0_i32 = arith.constant 0 : i32
    %c0_i32_0 = arith.constant 0 : i32
    %c0_i32_1 = arith.constant 0 : i32
    return %c0_i32, %c0_i32_0 : i32, i32
  }
  func.func @transform_6(%arg0: i32) -> (i32, i32) {
    %c0_i32 = arith.constant 0 : i32
    %c0_i32_0 = arith.constant 0 : i32
    %c0_i32_1 = arith.constant 0 : i32
    return %c0_i32, %c0_i32_0 : i32, i32
  }
  func.func @transform_7(%arg0: i32) -> (i32, i32) {
    %c0_i32 = arith.constant 0 : i32
    %c0_i32_0 = arith.constant 0 : i32
    %c0_i32_1 = arith.constant 0 : i32
    return %c0_i32, %c0_i32_0 : i32, i32
  }
  func.func @transform_8(%arg0: i32) -> (i32, i32) {
    %c0_i32 = arith.constant 0 : i32
    %c0_i32_0 = arith.constant 0 : i32
    %c0_i32_1 = arith.constant 0 : i32
    return %c0_i32, %c0_i32_0 : i32, i32
  }
  func.func @transform_9(%arg0: i32) -> (i32, i32) {
    %c0_i32 = arith.constant 0 : i32
    %c0_i32_0 = arith.constant 0 : i32
    %c0_i32_1 = arith.constant 0 : i32
    return %c0_i32, %c0_i32_0 : i32, i32
  }
  func.func @transform_10(%arg0: i32) -> (i32, i32) {
    %c0_i32 = arith.constant 0 : i32
    %c0_i32_0 = arith.constant 0 : i32
    %c0_i32_1 = arith.constant 0 : i32
    return %c0_i32, %c0_i32_0 : i32, i32
  }
  func.func @transform_11(%arg0: i32) -> (i32, i32) {
    %c0_i32 = arith.constant 0 : i32
    %c0_i32_0 = arith.constant 0 : i32
    %c0_i32_1 = arith.constant 0 : i32
    return %c0_i32, %c0_i32_0 : i32, i32
  }
  func.func @transform_12(%arg0: i32) -> (i32, i32) {
    %c0_i32 = arith.constant 0 : i32
    %c0_i32_0 = arith.constant 0 : i32
    %c0_i32_1 = arith.constant 0 : i32
    return %c0_i32, %c0_i32_0 : i32, i32
  }
  func.func @transform_13(%arg0: i32) -> (i32, i32) {
    %c0_i32 = arith.constant 0 : i32
    %c0_i32_0 = arith.constant 0 : i32
    %c0_i32_1 = arith.constant 0 : i32
    return %c0_i32, %c0_i32_0 : i32, i32
  }
  func.func @transform_14(%arg0: i32) -> (i32, i32) {
    %c0_i32 = arith.constant 0 : i32
    %c0_i32_0 = arith.constant 0 : i32
    %c0_i32_1 = arith.constant 0 : i32
    return %c0_i32, %c0_i32_0 : i32, i32
  }
  func.func @transform_15(%arg0: i32) -> (i32, i32) {
    %c0_i32 = arith.constant 0 : i32
    %c0_i32_0 = arith.constant 0 : i32
    %c0_i32_1 = arith.constant 0 : i32
    return %c0_i32, %c0_i32_0 : i32, i32
  }
}

</mosaic_0001>

<bundles_post_ra>
// kernel: gru_mean_with_covs_forward.1
= control target key start
LH: loop header
LB: loop body
LE: loop exit
PB: predicated region body
PF: predicated region fallthrough
CT: control target
= control target key end

     0   :  { %vm69_vm0 = vcmask 1044480   ;;  %vm65_vm1 = vcmask 39936   ;;  %v3295_v0 = vmov 0.0   ;;  %vm3296_vm2 = vmmov 0   ;;  %s4152_s3 = inlined_call_operand.vmem [shape: f32[5,128], index: 3, kind: input, shape index: {}]   ;;  %s4153_s2 = inlined_call_operand.vmem [shape: f32[8,5], index: 2, kind: input, shape index: {}]   ;;  %s4154_s5 = inlined_call_operand.vmem [shape: f32[4,384], index: 5, kind: input, shape index: {}]   ;;  %s4155_s6 = inlined_call_operand.vmem [shape: f32[128,384], index: 6, kind: input, shape index: {}]   ;;  %s4156_s0 = inlined_call_operand.vmem [shape: f32[8,8,4], index: 0, kind: input, shape index: {}]   ;;  %s4157_s1 = inlined_call_operand.vmem [shape: f32[1,4], index: 1, kind: input, shape index: {}]   ;;  %s4158_s4 = inlined_call_operand.vmem [shape: f32[1,128], index: 4, kind: input, shape index: {}]   ;;  %s4159_s7 = inlined_call_operand.vmem [shape: f32[1,384], index: 7, kind: input, shape index: {}]   ;;  %s4160_s8 = inlined_call_operand.vmem [shape: f32[1,128], index: 8, kind: input, shape index: {}]   ;;  %s4161_s9 = inlined_call_operand.vmem [shape: f32[128,128], index: 9, kind: input, shape index: {}]   ;;  %s4162_s11 = inlined_call_operand.vmem [shape: f32[128,128], index: 11, kind: input, shape index: {}]   ;;  %s4163_s10 = inlined_call_operand.vmem [shape: f32[1,128], index: 10, kind: input, shape index: {}]   ;;  %s4164_s14 = inlined_call_operand.<no memory space> [shape: f32[1,1], index: 14, kind: input, shape index: {}]   ;;  %s4165_s12 = inlined_call_operand.vmem [shape: f32[1,128], index: 12, kind: input, shape index: {}]   ;;  %s4166_s13 = inlined_call_operand.vmem [shape: f32[1,128], index: 13, kind: input, shape index: {}]   ;;  %s4167_s15 = inlined_call_operand.vmem [shape: f32[8,1], index: 15, kind: output, shape index: {}]  }
   0x1   :  { %2310 = vmatprep.subr.mxu0 %v3295_v0  ;;  %v57_v1 = vld [vmem:[%s4152_s3] sm:$0x1f]  ;;  %2312 = vmatprep.mubr.msk.f32.mxu0 %vm3296_vm2, %v3295_v0  ;;  %vm222_vm3 = vcmask 1043456   ;;  %v176_v5 = vld [vmem:[%s4154_s5 + $0x8] sm:$0xf]  ;;  %vm197_vm4 = vcmask 31744  }
   0x2   :  { %v56_v2 = vld [vmem:[%s4153_s2] sm:$0xff]  ;;  %2311 = vmatpush3.msk.msra.mxu0 %vm69_vm0, %v57_v1  ;;  %293 = vmatprep.mubr.f32.mxu1 %v3295_v0  ;;  %v477_v6 = vld [vmem:[%s4155_s6 + $0x8] sm:$0xff]  ;;  %v479_v12 = vld [vmem:[%s4155_s6 + $0x18] sm:$0xff]  ;;  %v3297_v17 = vmov 0.0|0.0   ;;  %vm2078_vm13 = vcmask 7168  }
   0x3   :  { %v175_v3 = vld [vmem:[%s4154_s5] sm:$0xff]  ;;  %2313 = vmatmul.mubr.msk.f32.vlgmr.msra.gmra.mrb[0].mxu0 %vm65_vm1, %v56_v2  ;;  %2315 = vmatprep.subr.msk.mxu0 %vm222_vm3, %v176_v5  ;;  %v145_v13 = vld [vmem:[%s4156_s0 + $0x8] sm:$0xff]  ;;  %v478_v14 = vld [vmem:[%s4155_s6 + $0x10] sm:$0xff] }
   0x4   :  { %v196_v4 = vcombine.high %v175_v3, %v175_v3  ;;  %v480_v7 = vld [vmem:[%s4155_s6 + $0x20] sm:$0xff]  ;;  %2316 = vmatpush3.msk.msra.mxu0 %vm222_vm3, %v176_v5  ;;  %vm153_vm6 = vcmp.ne.f32.partialorder %v145_v13, %v145_v13  ;;  %v481_v18 = vld [vmem:[%s4155_s6 + $0x28] sm:$0xff]  ;;  %v483_v19 = vld [vmem:[%s4155_s6 + $0x38] sm:$0xff] }
   0x5   :  { %v3402_v8 = vpack.c.bf16 %v480_v7, %v477_v6  ;;  %v144_v9 = vld [vmem:[%s4156_s0] sm:$0xff]  ;;  %2711 = vmatprep.subr.bf16.mxu0 %v3297_v17  ;;  %v486_v20 = vld [vmem:[%s4155_s6 + $0x50] sm:$0xff]  ;;  %v3443_v22 = vpack.c.bf16 %v481_v18, %v478_v14  ;;  %v485_v25 = vld [vmem:[%s4155_s6 + $0x48] sm:$0xff] }
   0x6   :  { %v3410_v10 = vld [vmem:[%s4157_s1] ss:$0 sm:$0xff]  ;;  %2088 = vmatprep.subr.msk.mxu1 %vm222_vm3, %v196_v4  ;;  %vm152_vm5 = vcmp.ne.f32.partialorder %v144_v9, %v144_v9  ;;  %v3445_v23 = vpack.c.bf16 %v486_v20, %v483_v19  ;;  %v482_v24 = vld [vmem:[%s4155_s6 + $0x30] sm:$0xff]  ;;  %v487_v28 = vld [vmem:[%s4155_s6 + $0x58] sm:$0xff] }
   0x7   :  { %v476_v11 = vld [vmem:[%s4155_s6] sm:$0xff]  ;;  %2089 = vmatpush1.msk.msra.mxu1 %vm222_vm3, %v175_v3  ;;  %v167_v15 = vsel %vm152_vm5, %v3410_v10, %v144_v9  ;;  %v168_v21 = vsel %vm153_vm6, %v3410_v10, %v145_v13  ;;  %v3458_v27 = vpack.c.bf16 %v485_v25, %v482_v24  ;;  %v489_v29 = vld [vmem:[%s4155_s6 + $0x68] sm:$0xff]  ;;  %v146_v32 = vld [vmem:[%s4156_s0 + $0x10] sm:$0xff] }
   0x8   :  { %v3428_v16 = vpack.c.bf16 %v479_v12, %v476_v11  ;;  %2680 = vmatprep.subr.bf16.mxu1 %v3402_v8  ;;  %2090 = vmatmul.mubr.msk.f32.vlgmr.msra.gmra.mrb[0].mxu1 %vm197_vm4, %v167_v15  ;;  %v484_v26 = vld [vmem:[%s4155_s6 + $0x40] sm:$0xff]  ;;  %v491_v34 = vld [vmem:[%s4155_s6 + $0x78] sm:$0xff]  ;;  %vm154_vm7 = vcmp.ne.f32.partialorder %v146_v32, %v146_v32  ;;  %v490_v36 = vld [vmem:[%s4155_s6 + $0x70] sm:$0xff] }
   0x9   :  { %2317 = vmatprep.mubr.msk.f32.mxu0 %vm197_vm4, %v167_v15  ;;  %v492_v30 = vld [vmem:[%s4155_s6 + $0x80] sm:$0xff]  ;;  %299 = vmatprep.mubr.f32.mxu1 %v3295_v0  ;;  %v3484_v35 = vpack.c.bf16 %v487_v28, %v484_v26  ;;  %v495_v37 = vld [vmem:[%s4155_s6 + $0x98] sm:$0xff]  ;;  %v493_v38 = vld [vmem:[%s4155_s6 + $0x88] sm:$0xff]  ;;  %v169_v41 = vsel %vm154_vm7, %v3410_v10, %v146_v32 }
   0xa   :  { %2682 = vmatpush1.bf16.msra.mxu1 %v3428_v16  ;;  %2318 = vmatmul.mubr.msk.f32.vlgmr.msra.gmra.mrb[2].mxu0 %vm197_vm4, %v168_v21  ;;  %v3471_v31 = vpack.c.bf16 %v492_v30, %v489_v29  ;;  %v488_v33 = vld [vmem:[%s4155_s6 + $0x60] sm:$0xff]  ;;  %v498_v39 = vld [vmem:[%s4155_s6 + $0xb0] sm:$0xff]  ;;  %v147_v40 = vld [vmem:[%s4156_s0 + $0x18] sm:$0xff]  ;;  %v3522_v47 = vpack.c.bf16 %v493_v38, %v490_v36 }
   0xb   :  { %2713 = vmatpush3.bf16.msra.mxu0 %v3443_v22  ;;  %2684 = vmatprep.subr.bf16.mxu1 %v3445_v23  ;;  %v3506_v42 = vpack.c.bf16 %v491_v34, %v488_v33  ;;  %v3509_v43 = vpack.c.bf16 %v498_v39, %v495_v37  ;;  %vm155_vm8 = vcmp.ne.f32.partialorder %v147_v40, %v147_v40  ;;  %v494_v44 = vld [vmem:[%s4155_s6 + $0x90] sm:$0xff]  ;;  %v497_v45 = vld [vmem:[%s4155_s6 + $0xa8] sm:$0xff]  ;;  %v148_v46 = vld [vmem:[%s4156_s0 + $0x20] sm:$0xff] }
   0xc   :  { %2091 = vmatmul.mubr.msk.f32.gmra.mrb[2].mxu1 %vm197_vm4, %v168_v21  ;;  %2714 = vmatprep.subr.bf16.mxu0 %v3297_v17  ;;  %v501_v48 = vld [vmem:[%s4155_s6 + $0xc8] sm:$0xff]  ;;  %v504_v49 = vld [vmem:[%s4155_s6 + $0xe0] sm:$0xff]  ;;  %vm156_vm9 = vcmp.ne.f32.partialorder %v148_v46, %v148_v46  ;;  %v499_v51 = vld [vmem:[%s4155_s6 + $0xb8] sm:$0xff]  ;;  %v170_v52 = vsel %vm155_vm8, %v3410_v10, %v147_v40  ;;  %v3542_v53 = vpack.c.bf16 %v497_v45, %v494_v44 }
   0xd   :  { %305 = vmatprep.mubr.f32.mxu1 %v3295_v0  ;;  %2320 = vmatprep.mubr.msk.f32.mxu0 %vm197_vm4, %v169_v41  ;;  %v496_v50 = vld [vmem:[%s4155_s6 + $0xa0] sm:$0xff]  ;;  %v149_v54 = vld [vmem:[%s4156_s0 + $0x28] sm:$0xff]  ;;  %v3548_v55 = vpack.c.bf16 %v504_v49, %v501_v48  ;;  %v171_v56 = vsel %vm156_vm9, %v3410_v10, %v148_v46  ;;  %v503_v58 = vld [vmem:[%s4155_s6 + $0xd8] sm:$0xff] }
   0xe   :  { %2686 = vmatpush1.bf16.msra.mxu1 %v3458_v27  ;;  %v500_v57 = vld [vmem:[%s4155_s6 + $0xc0] sm:$0xff]  ;;  %vm157_vm10 = vcmp.ne.f32.partialorder %v149_v54, %v149_v54  ;;  %2321 = vmatmul.mubr.msk.f32.gmra.mrb[4].mxu0 %vm197_vm4, %v170_v52  ;;  %v3559_v59 = vpack.c.bf16 %v499_v51, %v496_v50  ;;  %v507_v60 = vld [vmem:[%s4155_s6 + $0xf8] sm:$0xff]  ;;  %v510_v61 = vld [vmem:[%s4155_s6 + $0x110] sm:$0xff] }
   0xf   :  { %2688 = vmatprep.subr.bf16.mxu1 %v3471_v31  ;;  %2716 = vmatpush3.bf16.msra.mxu0 %v3484_v35  ;;  %v150_v62 = vld [vmem:[%s4156_s0 + $0x30] sm:$0xff]  ;;  %v505_v1 = vld [vmem:[%s4155_s6 + $0xe8] sm:$0xff]  ;;  %v3581_v2 = vpack.c.bf16 %v503_v58, %v500_v57  ;;  %v172_v3 = vsel %vm157_vm10, %v3410_v10, %v149_v54  ;;  %v151_v4 = vld [vmem:[%s4156_s0 + $0x38] sm:$0xff]  ;;  %v3589_v5 = vpack.c.bf16 %v510_v61, %v507_v60 }
  0x10   :  { %2092 = vmatmul.mubr.msk.f32.gmra.mrb[4].mxu1 %vm197_vm4, %v169_v41  ;;  %2717 = vmatprep.subr.bf16.mxu0 %v3297_v17  ;;  %v502_v63 = vld [vmem:[%s4155_s6 + $0xd0] sm:$0xff]  ;;  %vm158_vm11 = vcmp.ne.f32.partialorder %v150_v62, %v150_v62  ;;  %v509_v7 = vld [vmem:[%s4155_s6 + $0x108] sm:$0xff]  ;;  %vm159_vm12 = vcmp.ne.f32.partialorder %v151_v4, %v151_v4  ;;  %v516_v13 = vld [vmem:[%s4155_s6 + $0x140] sm:$0xff]  ;;  %v179_v41 = vlaneseq }
  0x11   :  { %311 = vmatprep.mubr.f32.mxu1 %v3295_v0  ;;  %2323 = vmatprep.mubr.msk.f32.mxu0 %vm197_vm4, %v171_v56  ;;  %v506_v6 = vld [vmem:[%s4155_s6 + $0xf0] sm:$0xff]  ;;  %v173_v9 = vsel %vm158_vm11, %v3410_v10, %v150_v62  ;;  %v3600_v11 = vpack.c.bf16 %v505_v1, %v502_v63  ;;  %v513_v12 = vld [vmem:[%s4155_s6 + $0x128] sm:$0xff]  ;;  %v174_v14 = vsel %vm159_vm12, %v3410_v10, %v151_v4  ;;  %v508_v15 = vld [vmem:[%s4155_s6 + $0x100] sm:$0xff] }
  0x12   :  { %2690 = vmatpush1.bf16.msra.mxu1 %v3506_v42  ;;  %2324 = vmatmul.mubr.msk.f32.gmra.mrb[6].mxu0 %vm197_vm4, %v172_v3  ;;  %v511_v18 = vld [vmem:[%s4155_s6 + $0x118] sm:$0xff]  ;;  %v3620_v19 = vpack.c.bf16 %v509_v7, %v506_v6  ;;  %v3623_v10 = vpack.c.bf16 %v516_v13, %v513_v12  ;;  %v512_v20 = vld [vmem:[%s4155_s6 + $0x120] sm:$0xff]  ;;  %v522_v26 = vld [vmem:[%s4155_s6 + $0x170] sm:$0xff]  ;;  %v3690_v44 = vshrl.u32 %v179_v41, 7 }
  0x13   :  { %2692 = vmatprep.subr.bf16.mxu1 %v3509_v43  ;;  %2719 = vmatpush3.bf16.msra.mxu0 %v3522_v47  ;;  %v515_v21 = vld [vmem:[%s4155_s6 + $0x138] sm:$0xff]  ;;  %v3633_v24 = vpack.c.bf16 %v511_v18, %v508_v15  ;;  %v514_v28 = vld [vmem:[%s4155_s6 + $0x130] sm:$0xff]  ;;  %v517_v29 = vld [vmem:[%s4155_s6 + $0x148] sm:$0xff] }
  0x14   :  { %2093 = vmatmul.mubr.msk.f32.gmra.mrb[6].mxu1 %vm197_vm4, %v170_v52  ;;  %2720 = vmatprep.subr.bf16.mxu0 %v3297_v17  ;;  %v519_v25 = vld [vmem:[%s4155_s6 + $0x158] sm:$0xff]  ;;  %v3653_v30 = vpack.c.bf16 %v515_v21, %v512_v20  ;;  %v518_v33 = vld [vmem:[%s4155_s6 + $0x150] sm:$0xff]  ;;  %v521_v34 = vld [vmem:[%s4155_s6 + $0x168] sm:$0xff]  ;;  %v3665_v36 = vpack.c.bf16 %v517_v29, %v514_v28  ;;  %v189_v46 = vsub.s32 2, %v3690_v44  ;;  %v181_v13 = vsub.s32 0, %v3690_v44 }
  0x15   :  { %317 = vmatprep.mubr.f32.mxu1 %v3295_v0  ;;  %2326 = vmatprep.mubr.msk.f32.mxu0 %vm197_vm4, %v173_v9  ;;  %v3656_v32 = vpack.c.bf16 %v522_v26, %v519_v25  ;;  %v3671_v37 = vpack.c.bf16 %v521_v34, %v518_v33  ;;  %v520_v38 = vld [vmem:[%s4155_s6 + $0x160] sm:$0xff]  ;;  %v523_v39 = vld [vmem:[%s4155_s6 + $0x178] sm:$0xff] }
  0x16   :  { %2694 = vmatpush1.bf16.msra.mxu1 %v3542_v53  ;;  %2327 = vmatmul.mubr.msk.f32.gmra.mrb[8].mxu0 %vm197_vm4, %v174_v14  ;;  %v3686_v40 = vpack.c.bf16 %v523_v39, %v520_v38  ;;  %v2084_v45 = vld [vmem:[%s4158_s4] ss:$0 sm:$0xff] }
  0x17   :  { %2696 = vmatprep.subr.bf16.mxu1 %v3548_v55  ;;  %2722 = vmatpush3.bf16.msra.mxu0 %v3559_v59  ;;  %v177_v48 = vld [vmem:[%s4159_s7] sm:$0x7] }
  0x18   :  { %2094 = vmatmul.mubr.msk.f32.gmra.mrb[8].mxu1 %vm197_vm4, %v171_v56  ;;  %2723 = vmatprep.subr.bf16.mxu0 %v3297_v17  ;;  %v3701_v52 = vrot.slane %v177_v48, %v189_v46  ;;  %v3765_v15 = vrot.slane %v177_v48, %v181_v13 }
  0x19   :  { %323 = vmatprep.mubr.f32.mxu1 %v3295_v0  ;;  %2361 = vmatprep.mubr.msk.f32.mxu0 %vm3296_vm2, %v3295_v0 }
  0x1a   :  { %2698 = vmatpush1.bf16.msra.mxu1 %v3581_v2 }
  0x1b   :  { %2700 = vmatprep.subr.bf16.mxu1 %v3589_v5  ;;  %2725 = vmatpush3.bf16.msra.mxu0 %v3600_v11 }
  0x1c   :  { %2095 = vmatmul.mubr.msk.f32.gmra.mrb[10].mxu1 %vm197_vm4, %v172_v3  ;;  %2726 = vmatprep.subr.bf16.mxu0 %v3297_v17 }
  0x1d   :  { %329 = vmatprep.mubr.f32.mxu1 %v3295_v0 }
  0x1e   :  { %2702 = vmatpush1.bf16.msra.mxu1 %v3620_v19 }
  0x1f   :  { %2704 = vmatprep.subr.bf16.mxu1 %v3623_v10  ;;  %2728 = vmatpush3.bf16.msra.mxu0 %v3633_v24 }
  0x20   :  { %2096 = vmatmul.mubr.msk.f32.gmra.mrb[12].mxu1 %vm197_vm4, %v173_v9  ;;  %2729 = vmatprep.subr.bf16.mxu0 %v3297_v17 }
  0x21   :  { %335 = vmatprep.mubr.f32.mxu1 %v3295_v0 }
  0x22   :  { %2706 = vmatpush1.bf16.msra.mxu1 %v3653_v30 }
  0x23   :  { %2708 = vmatprep.subr.bf16.mxu1 %v3656_v32  ;;  %2731 = vmatpush3.bf16.msra.mxu0 %v3665_v36 }
  0x24   :  { %2097 = vmatmul.mubr.msk.f32.gmra.mrb[14].mxu1 %vm197_vm4, %v174_v14  ;;  %2732 = vmatprep.subr.bf16.mxu0 %v3297_v17  ;;  %v185_v14 = vsub.s32 1, %v3690_v44  ;;  %v3774_v44 = vld [vmem:[%s4160_s8] ss:$0 sm:$0xff] }
  0x25   :  { %588 = vmatprep.mubr.f32.mxu1 %v3295_v0 }
  0x26   :  { %2710 = vmatpush1.bf16.msra.mxu1 %v3671_v37  ;;  %v3767_v21 = vrot.slane %v177_v48, %v185_v14 }
  0x27   :  { %2736 = vmatprep.subr.bf16.mxu1 %v3402_v8  ;;  %2734 = vmatpush3.bf16.msra.mxu0 %v3686_v40 }
  0x28   :  { %2767 = vmatprep.subr.bf16.mxu0 %v3297_v17 }
  0xd6   :  { %v139_v49 = vpop.f32.mrb[0].mxu0 }
  0xd7   :  { %v3699_v50 = vadd.f32 %v2084_v45, %v139_v49  ;;  %v2314_v51 = vpop.f32.mrb[1].mxu0 }
  0xd9   :  { %589 = vmatmul.mubr.f32.vlgmr.msra.gmra.mrb[0].mxu1 %v3699_v50  ;;  %2362 = vmatmul.mubr.f32.vlgmr.msra.gmra.mrb[10].mxu0 %v3699_v50 }
  0xda   :  { %2738 = vmatpush1.bf16.msra.mxu1 %v3428_v16  ;;  %2769 = vmatpush3.bf16.msra.mxu0 %v3443_v22 }
  0xdb   :  { %2740 = vmatprep.subr.bf16.mxu1 %v3445_v23  ;;  %2770 = vmatprep.subr.bf16.mxu0 %v3297_v17 }
  0xdc   :  { %761 = vmatprep.mubr.f32.mxu1 %v3295_v0  ;;  %2396 = vmatprep.mubr.msk.f32.mxu0 %vm3296_vm2, %v3295_v0 }
  0xdd   :  { %v2319_v54 = vpop.f32.mrb[2].mxu0 }
  0xde   :  { %v3710_v56 = vadd.f32 %v2319_v54, %v3701_v52  ;;  %v3712_v57 = vpop.f32.mrb[3].mxu0  ;;  %2742 = vmatpush1.bf16.msra.mxu1 %v3458_v27  ;;  %2772 = vmatpush3.bf16.msra.mxu0 %v3484_v35 }
  0xdf   :  { %2744 = vmatprep.subr.bf16.mxu1 %v3471_v31  ;;  %2773 = vmatprep.subr.bf16.mxu0 %v3297_v17  ;;  %v409_v49 = vadd.f32 %v3712_v57, %v3701_v52 }
  0xe1   :  { %v2322_v58 = vpop.f32.mrb[4].mxu0 }
  0xe2   :  { %2746 = vmatpush1.bf16.msra.mxu1 %v3506_v42  ;;  %2775 = vmatpush3.bf16.msra.mxu0 %v3522_v47  ;;  %v3726_v60 = vadd.f32 %v2322_v58, %v3701_v52  ;;  %v418_v61 = vpop.f32.mrb[5].mxu0 }
  0xe3   :  { %2748 = vmatprep.subr.bf16.mxu1 %v3509_v43  ;;  %2776 = vmatprep.subr.bf16.mxu0 %v3297_v17  ;;  %v3729_v62 = vadd.f32 %v418_v61, %v3701_v52 }
  0xe5   :  { %v2325_v63 = vpop.f32.mrb[6].mxu0 }
  0xe6   :  { %2750 = vmatpush1.bf16.msra.mxu1 %v3542_v53  ;;  %2778 = vmatpush3.bf16.msra.mxu0 %v3559_v59  ;;  %v3736_v1 = vadd.f32 %v2325_v63, %v3701_v52  ;;  %v428_v3 = vpop.f32.mrb[7].mxu0 }
  0xe7   :  { %2752 = vmatprep.subr.bf16.mxu1 %v3548_v55  ;;  %2779 = vmatprep.subr.bf16.mxu0 %v3297_v17  ;;  %v3739_v4 = vadd.f32 %v428_v3, %v3701_v52 }
  0xe9   :  { %v2328_v6 = vpop.f32.mrb[8].mxu0 }
  0xea   :  { %2754 = vmatpush1.bf16.msra.mxu1 %v3581_v2  ;;  %2781 = vmatpush3.bf16.msra.mxu0 %v3600_v11  ;;  %v3746_v7 = vadd.f32 %v2328_v6, %v3701_v52  ;;  %v438_v9 = vpop.f32.mrb[9].mxu0 }
  0xeb   :  { %2756 = vmatprep.subr.bf16.mxu1 %v3589_v5  ;;  %2782 = vmatprep.subr.bf16.mxu0 %v3297_v17  ;;  %v3749_v12 = vadd.f32 %v438_v9, %v3701_v52 }
  0xee   :  { %2758 = vmatpush1.bf16.msra.mxu1 %v3620_v19  ;;  %2784 = vmatpush3.bf16.msra.mxu0 %v3633_v24 }
  0xef   :  { %2760 = vmatprep.subr.bf16.mxu1 %v3623_v10  ;;  %2785 = vmatprep.subr.bf16.mxu0 %v3297_v17 }
  0xf2   :  { %2762 = vmatpush1.bf16.msra.mxu1 %v3653_v30  ;;  %2787 = vmatpush3.bf16.msra.mxu0 %v3665_v36 }
  0xf3   :  { %2764 = vmatprep.subr.bf16.mxu1 %v3656_v32  ;;  %2788 = vmatprep.subr.bf16.mxu0 %v3297_v17 }
  0xf6   :  { %2766 = vmatpush1.bf16.msra.mxu1 %v3671_v37  ;;  %2790 = vmatpush3.bf16.msra.mxu0 %v3686_v40 }
  0xf7   :  { %2792 = vmatprep.subr.bf16.mxu1 %v3402_v8  ;;  %2823 = vmatprep.subr.bf16.mxu0 %v3297_v17 }
 0x1ac   :  { %v590_v18 = vpop.f32.mrb[0].mxu1  ;;  %v661_v20 = vpop.f32.mrb[10].mxu0 }
 0x1ad   :  { %v3175_v25 = vadd.f32 %v590_v18, %v3765_v15  ;;  %v592_v26 = vpop.f32.mrb[1].mxu1  ;;  %v2363_v28 = vpop.f32.mrb[11].mxu0  ;;  %v685_v46 = vadd.f32 %v3774_v44, %v661_v20 }
 0x1ae   :  { %v3176_v33 = vadd.f32 %v592_v26, %v3767_v21 }
 0x1af   :  { %v2107_v29 = vmul.f32 -1.442695, %v3175_v25 }
 0x1b0   :  { %v2108_v34 = vmul.f32 -1.442695, %v3176_v33 }
 0x1b1   :  { %3211 = vpow2.f32 %v2107_v29 }
 0x1b2   :  { %3213 = vpow2.f32 %v2108_v34 }
 0x1bb   :  { %v3212_v38 = vpop.eup %3211 }
 0x1bc   :  { %v669_v39 = vadd.f32 1.0, %v3212_v38  ;;  %v3214_v41 = vpop.eup %3213 }
 0x1bd   :  { %v676_v45 = vadd.f32 1.0, %v3214_v41 }
 0x1be   :  { %3215 = vrcp.f32 %v669_v39 }
 0x1bf   :  { %3217 = vrcp.f32 %v676_v45 }
 0x1c8   :  { %v3216_v48 = vpop.eup %3215 }
 0x1c9   :  { %v686_v51 = vmul.f32 %v3216_v48, %v685_v46  ;;  %v3218_v58 = vpop.eup %3217 }
 0x1ca   :  { %v689_v61 = vsub.f32 1.0, %v3218_v58  ;;  %v691_v6 = vmul.f32 %v3218_v58, %v3699_v50 }
 0x1cb   :  { %v687_v54 = vadd.f32 %v686_v51, %v409_v49 }
 0x1cd   :  { %3219 = vtanh.f32 %v687_v54 }
 0x1d7   :  { %v3220_v63 = vpop.eup %3219 }
 0x1d8   :  { %v690_v3 = vmul.f32 %v3220_v63, %v689_v61 }
 0x1da   :  { %v692_v9 = vadd.f32 %v691_v6, %v690_v3 }
 0x1dc   :  { %762 = vmatmul.mubr.f32.vlgmr.msra.gmra.mrb[2].mxu1 %v692_v9  ;;  %2397 = vmatmul.mubr.f32.vlgmr.msra.gmra.mrb[12].mxu0 %v692_v9 }
 0x1dd   :  { %2794 = vmatpush1.bf16.msra.mxu1 %v3428_v16  ;;  %2825 = vmatpush3.bf16.msra.mxu0 %v3443_v22 }
 0x1de   :  { %2796 = vmatprep.subr.bf16.mxu1 %v3445_v23  ;;  %2826 = vmatprep.subr.bf16.mxu0 %v3297_v17 }
 0x1df   :  { %928 = vmatprep.mubr.f32.mxu1 %v3295_v0  ;;  %2431 = vmatprep.mubr.msk.f32.mxu0 %vm3296_vm2, %v3295_v0 }
 0x1e1   :  { %2798 = vmatpush1.bf16.msra.mxu1 %v3458_v27  ;;  %2828 = vmatpush3.bf16.msra.mxu0 %v3484_v35 }
 0x1e2   :  { %2800 = vmatprep.subr.bf16.mxu1 %v3471_v31  ;;  %2829 = vmatprep.subr.bf16.mxu0 %v3297_v17 }
 0x1e5   :  { %2802 = vmatpush1.bf16.msra.mxu1 %v3506_v42  ;;  %2831 = vmatpush3.bf16.msra.mxu0 %v3522_v47 }
 0x1e6   :  { %2804 = vmatprep.subr.bf16.mxu1 %v3509_v43  ;;  %2832 = vmatprep.subr.bf16.mxu0 %v3297_v17 }
 0x1e9   :  { %2806 = vmatpush1.bf16.msra.mxu1 %v3542_v53  ;;  %2834 = vmatpush3.bf16.msra.mxu0 %v3559_v59 }
 0x1ea   :  { %2808 = vmatprep.subr.bf16.mxu1 %v3548_v55  ;;  %2835 = vmatprep.subr.bf16.mxu0 %v3297_v17 }
 0x1ed   :  { %2810 = vmatpush1.bf16.msra.mxu1 %v3581_v2  ;;  %2837 = vmatpush3.bf16.msra.mxu0 %v3600_v11 }
 0x1ee   :  { %2812 = vmatprep.subr.bf16.mxu1 %v3589_v5  ;;  %2838 = vmatprep.subr.bf16.mxu0 %v3297_v17 }
 0x1f1   :  { %2814 = vmatpush1.bf16.msra.mxu1 %v3620_v19  ;;  %2840 = vmatpush3.bf16.msra.mxu0 %v3633_v24 }
 0x1f2   :  { %2816 = vmatprep.subr.bf16.mxu1 %v3623_v10  ;;  %2841 = vmatprep.subr.bf16.mxu0 %v3297_v17 }
 0x1f5   :  { %2818 = vmatpush1.bf16.msra.mxu1 %v3653_v30  ;;  %2843 = vmatpush3.bf16.msra.mxu0 %v3665_v36 }
 0x1f6   :  { %2820 = vmatprep.subr.bf16.mxu1 %v3656_v32  ;;  %2844 = vmatprep.subr.bf16.mxu0 %v3297_v17 }
 0x1f9   :  { %2822 = vmatpush1.bf16.msra.mxu1 %v3671_v37  ;;  %2846 = vmatpush3.bf16.msra.mxu0 %v3686_v40 }
 0x1fa   :  { %2848 = vmatprep.subr.bf16.mxu1 %v3402_v8  ;;  %2879 = vmatprep.subr.bf16.mxu0 %v3297_v17 }
 0x2af   :  { %v763_v50 = vpop.f32.mrb[2].mxu1  ;;  %v834_v52 = vpop.f32.mrb[12].mxu0 }
 0x2b0   :  { %v3177_v57 = vadd.f32 %v763_v50, %v3765_v15  ;;  %v765_v13 = vpop.f32.mrb[3].mxu1  ;;  %v2398_v14 = vpop.f32.mrb[13].mxu0  ;;  %v852_v34 = vadd.f32 %v3774_v44, %v834_v52 }
 0x2b1   :  { %v3178_v20 = vadd.f32 %v765_v13, %v3767_v21 }
 0x2b2   :  { %v2110_v18 = vmul.f32 -1.442695, %v3177_v57 }
 0x2b3   :  { %v2111_v25 = vmul.f32 -1.442695, %v3178_v20 }
 0x2b4   :  { %3221 = vpow2.f32 %v2110_v18 }
 0x2b5   :  { %3223 = vpow2.f32 %v2111_v25 }
 0x2be   :  { %v3222_v26 = vpop.eup %3221 }
 0x2bf   :  { %v842_v28 = vadd.f32 1.0, %v3222_v26  ;;  %v3224_v29 = vpop.eup %3223 }
 0x2c0   :  { %v849_v33 = vadd.f32 1.0, %v3224_v29 }
 0x2c1   :  { %3225 = vrcp.f32 %v842_v28 }
 0x2c2   :  { %3227 = vrcp.f32 %v849_v33 }
 0x2cb   :  { %v3226_v38 = vpop.eup %3225 }
 0x2cc   :  { %v853_v39 = vmul.f32 %v3226_v38, %v852_v34  ;;  %v3228_v45 = vpop.eup %3227 }
 0x2cd   :  { %v856_v46 = vsub.f32 1.0, %v3228_v45  ;;  %v858_v51 = vmul.f32 %v3228_v45, %v692_v9 }
 0x2ce   :  { %v854_v41 = vadd.f32 %v853_v39, %v3710_v56 }
 0x2d0   :  { %3229 = vtanh.f32 %v854_v41 }
 0x2da   :  { %v3230_v48 = vpop.eup %3229 }
 0x2db   :  { %v857_v49 = vmul.f32 %v3230_v48, %v856_v46 }
 0x2dd   :  { %v859_v54 = vadd.f32 %v858_v51, %v857_v49 }
 0x2df   :  { %929 = vmatmul.mubr.f32.vlgmr.msra.gmra.mrb[4].mxu1 %v859_v54  ;;  %2432 = vmatmul.mubr.f32.vlgmr.msra.gmra.mrb[14].mxu0 %v859_v54 }
 0x2e0   :  { %2850 = vmatpush1.bf16.msra.mxu1 %v3428_v16  ;;  %2881 = vmatpush3.bf16.msra.mxu0 %v3443_v22 }
 0x2e1   :  { %2852 = vmatprep.subr.bf16.mxu1 %v3445_v23  ;;  %2882 = vmatprep.subr.bf16.mxu0 %v3297_v17 }
 0x2e2   :  { %1095 = vmatprep.mubr.f32.mxu1 %v3295_v0  ;;  %2466 = vmatprep.mubr.msk.f32.mxu0 %vm3296_vm2, %v3295_v0 }
 0x2e4   :  { %2854 = vmatpush1.bf16.msra.mxu1 %v3458_v27  ;;  %2884 = vmatpush3.bf16.msra.mxu0 %v3484_v35 }
 0x2e5   :  { %2856 = vmatprep.subr.bf16.mxu1 %v3471_v31  ;;  %2885 = vmatprep.subr.bf16.mxu0 %v3297_v17 }
 0x2e8   :  { %2858 = vmatpush1.bf16.msra.mxu1 %v3506_v42  ;;  %2887 = vmatpush3.bf16.msra.mxu0 %v3522_v47 }
 0x2e9   :  { %2860 = vmatprep.subr.bf16.mxu1 %v3509_v43  ;;  %2888 = vmatprep.subr.bf16.mxu0 %v3297_v17 }
 0x2ec   :  { %2862 = vmatpush1.bf16.msra.mxu1 %v3542_v53  ;;  %2890 = vmatpush3.bf16.msra.mxu0 %v3559_v59 }
 0x2ed   :  { %2864 = vmatprep.subr.bf16.mxu1 %v3548_v55  ;;  %2891 = vmatprep.subr.bf16.mxu0 %v3297_v17 }
 0x2f0   :  { %2866 = vmatpush1.bf16.msra.mxu1 %v3581_v2  ;;  %2893 = vmatpush3.bf16.msra.mxu0 %v3600_v11 }
 0x2f1   :  { %2868 = vmatprep.subr.bf16.mxu1 %v3589_v5  ;;  %2894 = vmatprep.subr.bf16.mxu0 %v3297_v17 }
 0x2f4   :  { %2870 = vmatpush1.bf16.msra.mxu1 %v3620_v19  ;;  %2896 = vmatpush3.bf16.msra.mxu0 %v3633_v24 }
 0x2f5   :  { %2872 = vmatprep.subr.bf16.mxu1 %v3623_v10  ;;  %2897 = vmatprep.subr.bf16.mxu0 %v3297_v17 }
 0x2f8   :  { %2874 = vmatpush1.bf16.msra.mxu1 %v3653_v30  ;;  %2899 = vmatpush3.bf16.msra.mxu0 %v3665_v36 }
 0x2f9   :  { %2876 = vmatprep.subr.bf16.mxu1 %v3656_v32  ;;  %2900 = vmatprep.subr.bf16.mxu0 %v3297_v17 }
 0x2fc   :  { %2878 = vmatpush1.bf16.msra.mxu1 %v3671_v37  ;;  %2902 = vmatpush3.bf16.msra.mxu0 %v3686_v40 }
 0x2fd   :  { %2904 = vmatprep.subr.bf16.mxu1 %v3402_v8  ;;  %2935 = vmatprep.subr.bf16.mxu0 %v3297_v17 }
 0x3b2   :  { %v930_v56 = vpop.f32.mrb[4].mxu1  ;;  %v1001_v58 = vpop.f32.mrb[14].mxu0 }
 0x3b3   :  { %v3179_v61 = vadd.f32 %v930_v56, %v3765_v15  ;;  %v932_v63 = vpop.f32.mrb[5].mxu1  ;;  %v2433_v3 = vpop.f32.mrb[15].mxu0  ;;  %v1019_v18 = vadd.f32 %v3774_v44, %v1001_v58 }
 0x3b4   :  { %v3180_v9 = vadd.f32 %v932_v63, %v3767_v21 }
 0x3b5   :  { %v2112_v6 = vmul.f32 -1.442695, %v3179_v61 }
 0x3b6   :  { %v2113_v50 = vmul.f32 -1.442695, %v3180_v9 }
 0x3b7   :  { %3231 = vpow2.f32 %v2112_v6 }
 0x3b8   :  { %3233 = vpow2.f32 %v2113_v50 }
 0x3c1   :  { %v3232_v52 = vpop.eup %3231 }
 0x3c2   :  { %v1009_v57 = vadd.f32 1.0, %v3232_v52  ;;  %v3234_v13 = vpop.eup %3233 }
 0x3c3   :  { %v1016_v14 = vadd.f32 1.0, %v3234_v13 }
 0x3c4   :  { %3235 = vrcp.f32 %v1009_v57 }
 0x3c5   :  { %3237 = vrcp.f32 %v1016_v14 }
 0x3ce   :  { %v3236_v20 = vpop.eup %3235 }
 0x3cf   :  { %v1020_v25 = vmul.f32 %v3236_v20, %v1019_v18  ;;  %v3238_v28 = vpop.eup %3237 }
 0x3d0   :  { %v1023_v29 = vsub.f32 1.0, %v3238_v28  ;;  %v1025_v38 = vmul.f32 %v3238_v28, %v859_v54 }
 0x3d1   :  { %v1021_v26 = vadd.f32 %v1020_v25, %v3729_v62 }
 0x3d3   :  { %3239 = vtanh.f32 %v1021_v26 }
 0x3dd   :  { %v3240_v33 = vpop.eup %3239 }
 0x3de   :  { %v1024_v34 = vmul.f32 %v3240_v33, %v1023_v29 }
 0x3e0   :  { %v1026_v39 = vadd.f32 %v1025_v38, %v1024_v34 }
 0x3e2   :  { %1096 = vmatmul.mubr.f32.vlgmr.msra.gmra.mrb[6].mxu1 %v1026_v39  ;;  %2467 = vmatmul.mubr.f32.vlgmr.msra.gmra.mrb[16].mxu0 %v1026_v39 }
 0x3e3   :  { %2906 = vmatpush1.bf16.msra.mxu1 %v3428_v16  ;;  %2937 = vmatpush3.bf16.msra.mxu0 %v3443_v22 }
 0x3e4   :  { %2908 = vmatprep.subr.bf16.mxu1 %v3445_v23  ;;  %2938 = vmatprep.subr.bf16.mxu0 %v3297_v17 }
 0x3e5   :  { %1262 = vmatprep.mubr.f32.mxu1 %v3295_v0  ;;  %2501 = vmatprep.mubr.msk.f32.mxu0 %vm3296_vm2, %v3295_v0 }
 0x3e7   :  { %2910 = vmatpush1.bf16.msra.mxu1 %v3458_v27  ;;  %2940 = vmatpush3.bf16.msra.mxu0 %v3484_v35 }
 0x3e8   :  { %2912 = vmatprep.subr.bf16.mxu1 %v3471_v31  ;;  %2941 = vmatprep.subr.bf16.mxu0 %v3297_v17 }
 0x3eb   :  { %2914 = vmatpush1.bf16.msra.mxu1 %v3506_v42  ;;  %2943 = vmatpush3.bf16.msra.mxu0 %v3522_v47 }
 0x3ec   :  { %2916 = vmatprep.subr.bf16.mxu1 %v3509_v43  ;;  %2944 = vmatprep.subr.bf16.mxu0 %v3297_v17 }
 0x3ef   :  { %2918 = vmatpush1.bf16.msra.mxu1 %v3542_v53  ;;  %2946 = vmatpush3.bf16.msra.mxu0 %v3559_v59 }
 0x3f0   :  { %2920 = vmatprep.subr.bf16.mxu1 %v3548_v55  ;;  %2947 = vmatprep.subr.bf16.mxu0 %v3297_v17 }
 0x3f3   :  { %2922 = vmatpush1.bf16.msra.mxu1 %v3581_v2  ;;  %2949 = vmatpush3.bf16.msra.mxu0 %v3600_v11 }
 0x3f4   :  { %2924 = vmatprep.subr.bf16.mxu1 %v3589_v5  ;;  %2950 = vmatprep.subr.bf16.mxu0 %v3297_v17 }
 0x3f7   :  { %2926 = vmatpush1.bf16.msra.mxu1 %v3620_v19  ;;  %2952 = vmatpush3.bf16.msra.mxu0 %v3633_v24 }
 0x3f8   :  { %2928 = vmatprep.subr.bf16.mxu1 %v3623_v10  ;;  %2953 = vmatprep.subr.bf16.mxu0 %v3297_v17 }
 0x3fb   :  { %2930 = vmatpush1.bf16.msra.mxu1 %v3653_v30  ;;  %2955 = vmatpush3.bf16.msra.mxu0 %v3665_v36 }
 0x3fc   :  { %2932 = vmatprep.subr.bf16.mxu1 %v3656_v32  ;;  %2956 = vmatprep.subr.bf16.mxu0 %v3297_v17 }
 0x3ff   :  { %2934 = vmatpush1.bf16.msra.mxu1 %v3671_v37  ;;  %2958 = vmatpush3.bf16.msra.mxu0 %v3686_v40 }
 0x400   :  { %2960 = vmatprep.subr.bf16.mxu1 %v3402_v8  ;;  %2991 = vmatprep.subr.bf16.mxu0 %v3297_v17 }
 0x4b5   :  { %v1097_v62 = vpop.f32.mrb[6].mxu1  ;;  %v1168_v41 = vpop.f32.mrb[16].mxu0 }
 0x4b6   :  { %v3181_v45 = vadd.f32 %v1097_v62, %v3765_v15  ;;  %v1099_v46 = vpop.f32.mrb[7].mxu1  ;;  %v2468_v48 = vpop.f32.mrb[17].mxu0  ;;  %v1186_v3 = vadd.f32 %v3774_v44, %v1168_v41 }
 0x4b7   :  { %v3182_v51 = vadd.f32 %v1099_v46, %v3767_v21 }
 0x4b8   :  { %v2114_v49 = vmul.f32 -1.442695, %v3181_v45 }
 0x4b9   :  { %v2115_v54 = vmul.f32 -1.442695, %v3182_v51 }
 0x4ba   :  { %3241 = vpow2.f32 %v2114_v49 }
 0x4bb   :  { %3243 = vpow2.f32 %v2115_v54 }
 0x4c4   :  { %v3242_v56 = vpop.eup %3241 }
 0x4c5   :  { %v1176_v58 = vadd.f32 1.0, %v3242_v56  ;;  %v3244_v61 = vpop.eup %3243 }
 0x4c6   :  { %v1183_v63 = vadd.f32 1.0, %v3244_v61 }
 0x4c7   :  { %3245 = vrcp.f32 %v1176_v58 }
 0x4c8   :  { %3247 = vrcp.f32 %v1183_v63 }
 0x4d1   :  { %v3246_v6 = vpop.eup %3245 }
 0x4d2   :  { %v1187_v9 = vmul.f32 %v3246_v6, %v1186_v3  ;;  %v3248_v52 = vpop.eup %3247 }
 0x4d3   :  { %v1190_v57 = vsub.f32 1.0, %v3248_v52  ;;  %v1192_v18 = vmul.f32 %v3248_v52, %v1026_v39 }
 0x4d4   :  { %v1188_v50 = vadd.f32 %v1187_v9, %v3726_v60 }
 0x4d6   :  { %3249 = vtanh.f32 %v1188_v50 }
 0x4e0   :  { %v3250_v13 = vpop.eup %3249 }
 0x4e1   :  { %v1191_v14 = vmul.f32 %v3250_v13, %v1190_v57 }
 0x4e3   :  { %v1193_v20 = vadd.f32 %v1192_v18, %v1191_v14 }
 0x4e5   :  { %1263 = vmatmul.mubr.f32.vlgmr.msra.gmra.mrb[8].mxu1 %v1193_v20  ;;  %2502 = vmatmul.mubr.f32.vlgmr.msra.gmra.mrb[18].mxu0 %v1193_v20 }
 0x4e6   :  { %2962 = vmatpush1.bf16.msra.mxu1 %v3428_v16  ;;  %2993 = vmatpush3.bf16.msra.mxu0 %v3443_v22 }
 0x4e7   :  { %2964 = vmatprep.subr.bf16.mxu1 %v3445_v23  ;;  %2994 = vmatprep.subr.bf16.mxu0 %v3297_v17 }
 0x4e8   :  { %1429 = vmatprep.mubr.f32.mxu1 %v3295_v0  ;;  %2536 = vmatprep.mubr.msk.f32.mxu0 %vm3296_vm2, %v3295_v0 }
 0x4ea   :  { %2966 = vmatpush1.bf16.msra.mxu1 %v3458_v27  ;;  %2996 = vmatpush3.bf16.msra.mxu0 %v3484_v35 }
 0x4eb   :  { %2968 = vmatprep.subr.bf16.mxu1 %v3471_v31  ;;  %2997 = vmatprep.subr.bf16.mxu0 %v3297_v17 }
 0x4ee   :  { %2970 = vmatpush1.bf16.msra.mxu1 %v3506_v42  ;;  %2999 = vmatpush3.bf16.msra.mxu0 %v3522_v47 }
 0x4ef   :  { %2972 = vmatprep.subr.bf16.mxu1 %v3509_v43  ;;  %3000 = vmatprep.subr.bf16.mxu0 %v3297_v17 }
 0x4f2   :  { %2974 = vmatpush1.bf16.msra.mxu1 %v3542_v53  ;;  %3002 = vmatpush3.bf16.msra.mxu0 %v3559_v59 }
 0x4f3   :  { %2976 = vmatprep.subr.bf16.mxu1 %v3548_v55  ;;  %3003 = vmatprep.subr.bf16.mxu0 %v3297_v17 }
 0x4f6   :  { %2978 = vmatpush1.bf16.msra.mxu1 %v3581_v2  ;;  %3005 = vmatpush3.bf16.msra.mxu0 %v3600_v11 }
 0x4f7   :  { %2980 = vmatprep.subr.bf16.mxu1 %v3589_v5  ;;  %3006 = vmatprep.subr.bf16.mxu0 %v3297_v17 }
 0x4fa   :  { %2982 = vmatpush1.bf16.msra.mxu1 %v3620_v19  ;;  %3008 = vmatpush3.bf16.msra.mxu0 %v3633_v24 }
 0x4fb   :  { %2984 = vmatprep.subr.bf16.mxu1 %v3623_v10  ;;  %3009 = vmatprep.subr.bf16.mxu0 %v3297_v17 }
 0x4fe   :  { %2986 = vmatpush1.bf16.msra.mxu1 %v3653_v30  ;;  %3011 = vmatpush3.bf16.msra.mxu0 %v3665_v36 }
 0x4ff   :  { %2988 = vmatprep.subr.bf16.mxu1 %v3656_v32  ;;  %3012 = vmatprep.subr.bf16.mxu0 %v3297_v17 }
 0x502   :  { %2990 = vmatpush1.bf16.msra.mxu1 %v3671_v37  ;;  %3014 = vmatpush3.bf16.msra.mxu0 %v3686_v40 }
 0x503   :  { %3016 = vmatprep.subr.bf16.mxu1 %v3402_v8  ;;  %3047 = vmatprep.subr.bf16.mxu0 %v3297_v17 }
 0x5b8   :  { %v1264_v60 = vpop.f32.mrb[8].mxu1  ;;  %v1335_v25 = vpop.f32.mrb[18].mxu0 }
 0x5b9   :  { %v3183_v26 = vadd.f32 %v1264_v60, %v3765_v15  ;;  %v1266_v28 = vpop.f32.mrb[9].mxu1  ;;  %v2503_v29 = vpop.f32.mrb[19].mxu0  ;;  %v1353_v46 = vadd.f32 %v3774_v44, %v1335_v25 }
 0x5ba   :  { %v3184_v34 = vadd.f32 %v1266_v28, %v3767_v21 }
 0x5bb   :  { %v2116_v33 = vmul.f32 -1.442695, %v3183_v26 }
 0x5bc   :  { %v2117_v38 = vmul.f32 -1.442695, %v3184_v34 }
 0x5bd   :  { %3251 = vpow2.f32 %v2116_v33 }
 0x5be   :  { %3253 = vpow2.f32 %v2117_v38 }
 0x5c7   :  { %v3252_v39 = vpop.eup %3251 }
 0x5c8   :  { %v1343_v62 = vadd.f32 1.0, %v3252_v39  ;;  %v3254_v41 = vpop.eup %3253 }
 0x5c9   :  { %v1350_v45 = vadd.f32 1.0, %v3254_v41 }
 0x5ca   :  { %3255 = vrcp.f32 %v1343_v62 }
 0x5cb   :  { %3257 = vrcp.f32 %v1350_v45  ;;  %v1868_v45 = vld [vmem:[%s4161_s9 + $0x10] sm:$0xff] }
 0x5d4   :  { %v3256_v48 = vpop.eup %3255 }
 0x5d5   :  { %v1354_v49 = vmul.f32 %v3256_v48, %v1353_v46  ;;  %v3258_v54 = vpop.eup %3257  ;;  %v1870_v48 = vld [vmem:[%s4161_s9 + $0x20] sm:$0xff] }
 0x5d6   :  { %v1357_v56 = vsub.f32 1.0, %v3258_v54  ;;  %v1359_v63 = vmul.f32 %v3258_v54, %v1193_v20  ;;  %v1872_v54 = vld [vmem:[%s4161_s9 + $0x30] sm:$0xff] }
 0x5d7   :  { %v1355_v51 = vadd.f32 %v1354_v49, %v3739_v4  ;;  %v1871_v49 = vld [vmem:[%s4161_s9 + $0x28] sm:$0xff] }
 0x5d9   :  { %3259 = vtanh.f32 %v1355_v51  ;;  %v3134_v51 = vpack.c.bf16 %v1871_v49, %v1870_v48  ;;  %v1974_v48 = vld [vmem:[%s4162_s11 + $0x70] sm:$0xff] }
 0x5e3   :  { %v3260_v58 = vpop.eup %3259 }
 0x5e4   :  { %v1358_v61 = vmul.f32 %v3260_v58, %v1357_v56  ;;  %v1873_v56 = vld [vmem:[%s4161_s9 + $0x38] sm:$0xff] }
 0x5e5   :  { %v3137_v58 = vpack.c.bf16 %v1873_v56, %v1872_v54 }
 0x5e6   :  { %v1360_v3 = vadd.f32 %v1359_v63, %v1358_v61  ;;  %v1874_v61 = vld [vmem:[%s4161_s9 + $0x40] sm:$0xff]  ;;  %v1875_v63 = vld [vmem:[%s4161_s9 + $0x48] sm:$0xff] }
 0x5e8   :  { %1430 = vmatmul.mubr.f32.vlgmr.msra.gmra.mrb[10].mxu1 %v1360_v3  ;;  %2537 = vmatmul.mubr.f32.vlgmr.msra.gmra.mrb[20].mxu0 %v1360_v3 }
 0x5e9   :  { %3018 = vmatpush1.bf16.msra.mxu1 %v3428_v16  ;;  %3049 = vmatpush3.bf16.msra.mxu0 %v3443_v22 }
 0x5ea   :  { %3020 = vmatprep.subr.bf16.mxu1 %v3445_v23  ;;  %3050 = vmatprep.subr.bf16.mxu0 %v3297_v17 }
 0x5eb   :  { %1596 = vmatprep.mubr.f32.mxu1 %v3295_v0  ;;  %2571 = vmatprep.mubr.msk.f32.mxu0 %vm3296_vm2, %v3295_v0 }
 0x5ed   :  { %3022 = vmatpush1.bf16.msra.mxu1 %v3458_v27  ;;  %3052 = vmatpush3.bf16.msra.mxu0 %v3484_v35 }
 0x5ee   :  { %3024 = vmatprep.subr.bf16.mxu1 %v3471_v31  ;;  %3053 = vmatprep.subr.bf16.mxu0 %v3297_v17 }
 0x5f1   :  { %3026 = vmatpush1.bf16.msra.mxu1 %v3506_v42  ;;  %3055 = vmatpush3.bf16.msra.mxu0 %v3522_v47 }
 0x5f2   :  { %3028 = vmatprep.subr.bf16.mxu1 %v3509_v43  ;;  %3056 = vmatprep.subr.bf16.mxu0 %v3297_v17 }
 0x5f5   :  { %3030 = vmatpush1.bf16.msra.mxu1 %v3542_v53  ;;  %3058 = vmatpush3.bf16.msra.mxu0 %v3559_v59 }
 0x5f6   :  { %3032 = vmatprep.subr.bf16.mxu1 %v3548_v55  ;;  %3059 = vmatprep.subr.bf16.mxu0 %v3297_v17 }
 0x5f9   :  { %3034 = vmatpush1.bf16.msra.mxu1 %v3581_v2  ;;  %3061 = vmatpush3.bf16.msra.mxu0 %v3600_v11 }
 0x5fa   :  { %3036 = vmatprep.subr.bf16.mxu1 %v3589_v5  ;;  %3062 = vmatprep.subr.bf16.mxu0 %v3297_v17 }
 0x5fd   :  { %3038 = vmatpush1.bf16.msra.mxu1 %v3620_v19  ;;  %3064 = vmatpush3.bf16.msra.mxu0 %v3633_v24 }
 0x5fe   :  { %3040 = vmatprep.subr.bf16.mxu1 %v3623_v10  ;;  %3065 = vmatprep.subr.bf16.mxu0 %v3297_v17 }
 0x601   :  { %3042 = vmatpush1.bf16.msra.mxu1 %v3653_v30  ;;  %3067 = vmatpush3.bf16.msra.mxu0 %v3665_v36 }
 0x602   :  { %3044 = vmatprep.subr.bf16.mxu1 %v3656_v32  ;;  %3068 = vmatprep.subr.bf16.mxu0 %v3297_v17 }
 0x605   :  { %3046 = vmatpush1.bf16.msra.mxu1 %v3671_v37  ;;  %3070 = vmatpush3.bf16.msra.mxu0 %v3686_v40 }
 0x606   :  { %3072 = vmatprep.subr.bf16.mxu1 %v3402_v8  ;;  %3103 = vmatprep.subr.bf16.mxu0 %v3297_v17 }
 0x6bb   :  { %v1431_v4 = vpop.f32.mrb[10].mxu1  ;;  %v1502_v6 = vpop.f32.mrb[20].mxu0 }
 0x6bc   :  { %v3185_v9 = vadd.f32 %v1431_v4, %v3765_v15  ;;  %v1433_v50 = vpop.f32.mrb[11].mxu1  ;;  %v2538_v52 = vpop.f32.mrb[21].mxu0  ;;  %v1520_v8 = vadd.f32 %v3774_v44, %v1502_v6  ;;  %v1876_v4 = vld [vmem:[%s4161_s9 + $0x50] sm:$0xff]  ;;  %v1877_v6 = vld [vmem:[%s4161_s9 + $0x58] sm:$0xff] }
 0x6bd   :  { %v3186_v13 = vadd.f32 %v1433_v50, %v3767_v21  ;;  %v1878_v50 = vld [vmem:[%s4161_s9 + $0x60] sm:$0xff]  ;;  %v1879_v52 = vld [vmem:[%s4161_s9 + $0x68] sm:$0xff] }
 0x6be   :  { %v2118_v57 = vmul.f32 -1.442695, %v3185_v9  ;;  %v3143_v9 = vpack.c.bf16 %v1877_v6, %v1876_v4  ;;  %v2126_v6 = vld [vmem:[%s4166_s13] ss:$0 sm:$0xff] }
 0x6bf   :  { %v2119_v14 = vmul.f32 -1.442695, %v3186_v13  ;;  %v1880_v13 = vld [vmem:[%s4161_s9 + $0x70] sm:$0xff] }
 0x6c0   :  { %3261 = vpow2.f32 %v2118_v57  ;;  %v3146_v57 = vpack.c.bf16 %v1879_v52, %v1878_v50 }
 0x6c1   :  { %3263 = vpow2.f32 %v2119_v14  ;;  %v1881_v14 = vld [vmem:[%s4161_s9 + $0x78] sm:$0xff] }
 0x6ca   :  { %v3262_v18 = vpop.eup %3261 }
 0x6cb   :  { %v1510_v20 = vadd.f32 1.0, %v3262_v18  ;;  %v3264_v60 = vpop.eup %3263  ;;  %v3149_v18 = vpack.c.bf16 %v1881_v14, %v1880_v13 }
 0x6cc   :  { %v1517_v25 = vadd.f32 1.0, %v3264_v60  ;;  %v1961_v60 = vld [vmem:[%s4162_s11 + $0x8] sm:$0xff] }
 0x6cd   :  { %3265 = vrcp.f32 %v1510_v20  ;;  %v1960_v20 = vld [vmem:[%s4162_s11] sm:$0xff] }
 0x6ce   :  { %3267 = vrcp.f32 %v1517_v25  ;;  %v1962_v25 = vld [vmem:[%s4162_s11 + $0x10] sm:$0xff] }
 0x6d7   :  { %v3266_v26 = vpop.eup %3265 }
 0x6d8   :  { %v1521_v28 = vmul.f32 %v3266_v26, %v1520_v8  ;;  %v3268_v33 = vpop.eup %3267  ;;  %v3152_v8 = vpack.c.bf16 %v1961_v60, %v1960_v20  ;;  %v1963_v26 = vld [vmem:[%s4162_s11 + $0x18] sm:$0xff] }
 0x6d9   :  { %v1524_v34 = vsub.f32 1.0, %v3268_v33  ;;  %v1526_v62 = vmul.f32 %v3268_v33, %v1360_v3  ;;  %v3140_v3 = vpack.c.bf16 %v1875_v63, %v1874_v61  ;;  %v1965_v33 = vld [vmem:[%s4162_s11 + $0x28] sm:$0xff]  ;;  %v2125_v61 = vld [vmem:[%s4165_s12] ss:$0 sm:$0xff] }
 0x6da   :  { %v1522_v29 = vadd.f32 %v1521_v28, %v3736_v1  ;;  %v1867_v1 = vld [vmem:[%s4161_s9 + $0x8] sm:$0xff]  ;;  %v3155_v28 = vpack.c.bf16 %v1963_v26, %v1962_v25 }
 0x6dc   :  { %3269 = vtanh.f32 %v1522_v29  ;;  %v1964_v29 = vld [vmem:[%s4162_s11 + $0x20] sm:$0xff] }
 0x6e6   :  { %v3270_v38 = vpop.eup %3269 }
 0x6e7   :  { %v1525_v39 = vmul.f32 %v3270_v38, %v1524_v34  ;;  %v3158_v34 = vpack.c.bf16 %v1965_v33, %v1964_v29  ;;  %v1966_v38 = vld [vmem:[%s4162_s11 + $0x30] sm:$0xff] }
 0x6e9   :  { %v1527_v41 = vadd.f32 %v1526_v62, %v1525_v39  ;;  %v1967_v39 = vld [vmem:[%s4162_s11 + $0x38] sm:$0xff] }
 0x6ea   :  { %v3161_v62 = vpack.c.bf16 %v1967_v39, %v1966_v38 }
 0x6eb   :  { %1597 = vmatmul.mubr.f32.vlgmr.msra.gmra.mrb[12].mxu1 %v1527_v41  ;;  %2572 = vmatmul.mubr.f32.vlgmr.msra.gmra.mrb[22].mxu0 %v1527_v41 }
 0x6ec   :  { %3074 = vmatpush1.bf16.msra.mxu1 %v3428_v16  ;;  %3105 = vmatpush3.bf16.msra.mxu0 %v3443_v22 }
 0x6ed   :  { %3076 = vmatprep.subr.bf16.mxu1 %v3445_v23  ;;  %3106 = vmatprep.subr.bf16.mxu0 %v3297_v17 }
 0x6ee   :  { %1763 = vmatprep.mubr.f32.mxu1 %v3295_v0  ;;  %2606 = vmatprep.mubr.msk.f32.mxu0 %vm3296_vm2, %v3295_v0 }
 0x6f0   :  { %3078 = vmatpush1.bf16.msra.mxu1 %v3458_v27  ;;  %3108 = vmatpush3.bf16.msra.mxu0 %v3484_v35 }
 0x6f1   :  { %3080 = vmatprep.subr.bf16.mxu1 %v3471_v31  ;;  %3109 = vmatprep.subr.bf16.mxu0 %v3297_v17 }
 0x6f4   :  { %3082 = vmatpush1.bf16.msra.mxu1 %v3506_v42  ;;  %3111 = vmatpush3.bf16.msra.mxu0 %v3522_v47 }
 0x6f5   :  { %3084 = vmatprep.subr.bf16.mxu1 %v3509_v43  ;;  %3112 = vmatprep.subr.bf16.mxu0 %v3297_v17 }
 0x6f8   :  { %3086 = vmatpush1.bf16.msra.mxu1 %v3542_v53  ;;  %3114 = vmatpush3.bf16.msra.mxu0 %v3559_v59 }
 0x6f9   :  { %3088 = vmatprep.subr.bf16.mxu1 %v3548_v55  ;;  %3115 = vmatprep.subr.bf16.mxu0 %v3297_v17 }
 0x6fc   :  { %3090 = vmatpush1.bf16.msra.mxu1 %v3581_v2  ;;  %3117 = vmatpush3.bf16.msra.mxu0 %v3600_v11 }
 0x6fd   :  { %3092 = vmatprep.subr.bf16.mxu1 %v3589_v5  ;;  %3118 = vmatprep.subr.bf16.mxu0 %v3297_v17 }
 0x700   :  { %3094 = vmatpush1.bf16.msra.mxu1 %v3620_v19  ;;  %3120 = vmatpush3.bf16.msra.mxu0 %v3633_v24 }
 0x701   :  { %3096 = vmatprep.subr.bf16.mxu1 %v3623_v10  ;;  %3121 = vmatprep.subr.bf16.mxu0 %v3297_v17 }
 0x704   :  { %3098 = vmatpush1.bf16.msra.mxu1 %v3653_v30  ;;  %3123 = vmatpush3.bf16.msra.mxu0 %v3665_v36 }
 0x705   :  { %3100 = vmatprep.subr.bf16.mxu1 %v3656_v32  ;;  %3124 = vmatprep.subr.bf16.mxu0 %v3297_v17 }
 0x708   :  { %3102 = vmatpush1.bf16.msra.mxu1 %v3671_v37  ;;  %3126 = vmatpush3.bf16.msra.mxu0 %v3686_v40  ;;  %v1866_v40 = vld [vmem:[%s4161_s9] sm:$0xff] }
 0x709   :  { %3127 = vmatprep.subr.bf16.mxu1 %v3297_v17  ;;  %3151 = vmatprep.subr.bf16.mxu0 %v3297_v17 }
 0x7be   :  { %v1598_v16 = vpop.f32.mrb[12].mxu1  ;;  %v1669_v22 = vpop.f32.mrb[22].mxu0 }
 0x7bf   :  { %v3187_v23 = vadd.f32 %v1598_v16, %v3765_v15  ;;  %v1600_v27 = vpop.f32.mrb[13].mxu1  ;;  %v2573_v31 = vpop.f32.mrb[23].mxu0  ;;  %v1687_v2 = vadd.f32 %v3774_v44, %v1669_v22  ;;  %v1969_v16 = vld [vmem:[%s4162_s11 + $0x48] sm:$0xff] }
 0x7c0   :  { %v3188_v42 = vadd.f32 %v1600_v27, %v3767_v21  ;;  %v1971_v27 = vld [vmem:[%s4162_s11 + $0x58] sm:$0xff] }
 0x7c1   :  { %v2120_v35 = vmul.f32 -1.442695, %v3187_v23  ;;  %v1970_v23 = vld [vmem:[%s4162_s11 + $0x50] sm:$0xff] }
 0x7c2   :  { %v2121_v43 = vmul.f32 -1.442695, %v3188_v42  ;;  %v3167_v31 = vpack.c.bf16 %v1971_v27, %v1970_v23  ;;  %v1973_v42 = vld [vmem:[%s4162_s11 + $0x68] sm:$0xff] }
 0x7c3   :  { %3271 = vpow2.f32 %v2120_v35  ;;  %v1972_v35 = vld [vmem:[%s4162_s11 + $0x60] sm:$0xff] }
 0x7c4   :  { %3273 = vpow2.f32 %v2121_v43  ;;  %v3170_v43 = vpack.c.bf16 %v1973_v42, %v1972_v35 }
 0x7cd   :  { %v3272_v47 = vpop.eup %3271 }
 0x7ce   :  { %v1677_v53 = vadd.f32 1.0, %v3272_v47  ;;  %v3274_v55 = vpop.eup %3273 }
 0x7cf   :  { %v1684_v59 = vadd.f32 1.0, %v3274_v55 }
 0x7d0   :  { %3275 = vrcp.f32 %v1677_v53 }
 0x7d1   :  { %3277 = vrcp.f32 %v1684_v59 }
 0x7da   :  { %v3276_v5 = vpop.eup %3275 }
 0x7db   :  { %v1688_v11 = vmul.f32 %v3276_v5, %v1687_v2  ;;  %v3278_v10 = vpop.eup %3277 }
 0x7dc   :  { %v1691_v24 = vsub.f32 1.0, %v3278_v10  ;;  %v1693_v36 = vmul.f32 %v3278_v10, %v1527_v41  ;;  %v1968_v41 = vld [vmem:[%s4162_s11 + $0x40] sm:$0xff] }
 0x7dd   :  { %v1689_v19 = vadd.f32 %v1688_v11, %v3749_v12  ;;  %v3128_v12 = vpack.c.bf16 %v1867_v1, %v1866_v40  ;;  %v3164_v22 = vpack.c.bf16 %v1969_v16, %v1968_v41 }
 0x7df   :  { %3279 = vtanh.f32 %v1689_v19 }
 0x7e9   :  { %v3280_v30 = vpop.eup %3279 }
 0x7ea   :  { %v1692_v32 = vmul.f32 %v3280_v30, %v1691_v24 }
 0x7ec   :  { %v4014_v37 = vadd.f32 %v1693_v36, %v1692_v32 }
 0x7ee   :  { %1764 = vmatmul.mubr.f32.vlgmr.msra.gmra.mrb[14].mxu1 %v4014_v37  ;;  %2607 = vmatmul.mubr.f32.vlgmr.msra.gmra.mrb[24].mxu0 %v4014_v37 }
 0x7ef   :  { %2641 = vmatprep.mubr.msk.f32.mxu1 %vm3296_vm2, %v3295_v0  ;;  %2676 = vmatprep.mubr.msk.f32.mxu0 %vm3296_vm2, %v3295_v0  ;;  %v1869_v0 = vld [vmem:[%s4161_s9 + $0x18] sm:$0xff] }
 0x7f0   :  { %3129 = vmatpush3.bf16.msra.mxu1 %v3128_v12  ;;  %v3131_v46 = vpack.c.bf16 %v1869_v0, %v1868_v45  ;;  %3153 = vmatpush3.bf16.msra.mxu0 %v3152_v8 }
 0x7f1   :  { %3130 = vmatprep.subr.bf16.mxu1 %v3297_v17  ;;  %3154 = vmatprep.subr.bf16.mxu0 %v3297_v17 }
 0x7f4   :  { %3132 = vmatpush3.bf16.msra.mxu1 %v3131_v46  ;;  %3156 = vmatpush3.bf16.msra.mxu0 %v3155_v28 }
 0x7f5   :  { %3133 = vmatprep.subr.bf16.mxu1 %v3297_v17  ;;  %3157 = vmatprep.subr.bf16.mxu0 %v3297_v17 }
 0x7f8   :  { %3135 = vmatpush3.bf16.msra.mxu1 %v3134_v51  ;;  %3159 = vmatpush3.bf16.msra.mxu0 %v3158_v34 }
 0x7f9   :  { %3136 = vmatprep.subr.bf16.mxu1 %v3297_v17  ;;  %3160 = vmatprep.subr.bf16.mxu0 %v3297_v17 }
 0x7fc   :  { %3138 = vmatpush3.bf16.msra.mxu1 %v3137_v58  ;;  %3162 = vmatpush3.bf16.msra.mxu0 %v3161_v62  ;;  %v20_v58 = vstv %s4164_s14 }
 0x7fd   :  { %3139 = vmatprep.subr.bf16.mxu1 %v3297_v17  ;;  %3163 = vmatprep.subr.bf16.mxu0 %v3297_v17  ;;  %21 = vst [vmem:[#allocation4] sm:$0x1] %v20_v58 }
 0x800   :  { %3141 = vmatpush3.bf16.msra.mxu1 %v3140_v3  ;;  %3165 = vmatpush3.bf16.msra.mxu0 %v3164_v22 }
 0x801   :  { %3142 = vmatprep.subr.bf16.mxu1 %v3297_v17  ;;  %3166 = vmatprep.subr.bf16.mxu0 %v3297_v17 }
 0x804   :  { %3144 = vmatpush3.bf16.msra.mxu1 %v3143_v9  ;;  %3168 = vmatpush3.bf16.msra.mxu0 %v3167_v31  ;;  %v2127_v52 = vld [vmem:[#allocation4] ss:$0 sm:$0xff] }
 0x805   :  { %3145 = vmatprep.subr.bf16.mxu1 %v3297_v17  ;;  %3169 = vmatprep.subr.bf16.mxu0 %v3297_v17 }
 0x808   :  { %3147 = vmatpush3.bf16.msra.mxu1 %v3146_v57  ;;  %3171 = vmatpush3.bf16.msra.mxu0 %v3170_v43 }
 0x809   :  { %3148 = vmatprep.subr.bf16.mxu1 %v3297_v17  ;;  %3172 = vmatprep.subr.bf16.mxu0 %v3297_v17 }
 0x80c   :  { %3150 = vmatpush3.bf16.msra.mxu1 %v3149_v18 }
 0x8c1   :  { %v1765_v47 = vpop.f32.mrb[14].mxu1  ;;  %v1836_v53 = vpop.f32.mrb[24].mxu0 }
 0x8c2   :  { %v3189_v55 = vadd.f32 %v1765_v47, %v3765_v15  ;;  %v1767_v59 = vpop.f32.mrb[15].mxu1  ;;  %v2608_v2 = vpop.f32.mrb[25].mxu0  ;;  %v1854_v36 = vadd.f32 %v3774_v44, %v1836_v53  ;;  %v1975_v44 = vld [vmem:[%s4162_s11 + $0x78] sm:$0xff] }
 0x8c3   :  { %v3190_v11 = vadd.f32 %v1767_v59, %v3767_v21  ;;  %v3173_v49 = vpack.c.bf16 %v1975_v44, %v1974_v48 }
 0x8c4   :  { %v2122_v5 = vmul.f32 -1.442695, %v3189_v55 }
 0x8c5   :  { %v2123_v19 = vmul.f32 -1.442695, %v3190_v11  ;;  %3174 = vmatpush3.bf16.msra.mxu0 %v3173_v49 }
 0x8c6   :  { %3281 = vpow2.f32 %v2122_v5 }
 0x8c7   :  { %3283 = vpow2.f32 %v2123_v19 }
 0x8d0   :  { %v3282_v10 = vpop.eup %3281 }
 0x8d1   :  { %v1844_v24 = vadd.f32 1.0, %v3282_v10  ;;  %v3284_v30 = vpop.eup %3283 }
 0x8d2   :  { %v1851_v32 = vadd.f32 1.0, %v3284_v30 }
 0x8d3   :  { %3285 = vrcp.f32 %v1844_v24 }
 0x8d4   :  { %3287 = vrcp.f32 %v1851_v32 }
 0x8dd   :  { %v3286_v17 = vpop.eup %3285 }
 0x8de   :  { %v1855_v40 = vmul.f32 %v3286_v17, %v1854_v36  ;;  %v3288_v1 = vpop.eup %3287 }
 0x8df   :  { %v1858_v12 = vsub.f32 1.0, %v3288_v1  ;;  %v1860_v0 = vmul.f32 %v3288_v1, %v4014_v37 }
 0x8e0   :  { %v1856_v15 = vadd.f32 %v1855_v40, %v3746_v7  ;;  %v2124_v7 = vld [vmem:[%s4163_s10] ss:$0 sm:$0xff] }
 0x8e2   :  { %3289 = vtanh.f32 %v1856_v15 }
 0x8ec   :  { %v3290_v45 = vpop.eup %3289 }
 0x8ed   :  { %v1859_v21 = vmul.f32 %v3290_v45, %v1858_v12 }
 0x8ef   :  { %v1861_v46 = vadd.f32 %v1860_v0, %v1859_v21 }
 0x8f1   :  { %2642 = vmatmul.mubr.f32.vlgmr.msra.gmra.mrb[16].mxu1 %v1861_v46 }
 0x9c4   :  { %v1955_v51 = vpop.f32.mrb[16].mxu1 }
 0x9c5   :  { %v1956_v54 = vadd.f32 %v2124_v7, %v1955_v51  ;;  %v2643_v56 = vpop.f32.mrb[17].mxu1 }
 0x9c7   :  { %v1959_v37 = vmax.f32 %v1956_v54, 0.0 }
 0x9c9   :  { %2677 = vmatmul.mubr.f32.vlgmr.msra.gmra.mrb[26].mxu0 %v1959_v37 }
 0xa9c   :  { %v2049_v63 = vpop.f32.mrb[26].mxu0 }
 0xa9d   :  { %v2050_v3 = vadd.f32 %v2125_v61, %v2049_v63  ;;  %v2678_v4 = vpop.f32.mrb[27].mxu0 }
 0xa9f   :  { %v2053_v9 = vmax.f32 %v2050_v3, 0.0 }
 0xaa1   :  { %v2061_v50 = vmul.f32 %v2126_v6, %v2053_v9 }
 0xaa3   :  { %2062 = vadd.xlane.f32.xlu0 %v2061_v50 }
 0xb30   :  { %v2063_v57 = vpop.xlane.xlu0 %2062 }
 0xb31   :  { %v2071_v13 = vadd.f32 %v2127_v52, %v2063_v57 }
 0xb33   :  { %v2128_v14 = vmul.f32 -1.442695, %v2071_v13 }
 0xb35   :  { %3291 = vpow2.f32 %v2128_v14 }
 0xb3f   :  { %v3292_v18 = vpop.eup %3291 }
 0xb40   :  { %v2075_v20 = vadd.f32 1.0, %v3292_v18 }
 0xb42   :  { %3293 = vrcp.f32 %v2075_v20 }
 0xb4c   :  { %v3294_v60 = vpop.eup %3293 }
 0xb4d   :  { %2079 = vst.msk [vmem:[%s4167_s15] sm:$0xff] %vm2078_vm13, %v3294_v60 }

</bundles_post_ra>
